<compile_context>
chip_gen: v5e
topology: v5e:2x2
jax: 0.10.0
libtpu: 0.0.40
codegen_flags: <defaults>
</compile_context>

<pallas_src>
import jax
import jax.numpy as jnp
from jax.experimental import pallas as pl
from jax.experimental.pallas import tpu as pltpu

_LANE = 128
_SUBLANE = 8


def _round_up(n, m):
    return ((n + m - 1) // m) * m


# ------------------------------- kernel body --------------------------------

def _regression_head_kernel(
    x_ref,
    w1_ref, b1_ref,
    w2_ref, b2_ref,
    w3_ref, b3_ref,
    w4_ref, b4_ref,
    o_ref,
):
    """Fused MLP: (Linear + ReLU) x3 -> Linear.  One batch tile per grid step."""
    compute_dtype = x_ref.dtype
    h = x_ref[...]  # compute dtype (bf16 by default) straight into the MXU.

    z = jnp.dot(h, w1_ref[...], preferred_element_type=jnp.float32) + b1_ref[...]
    h = jnp.maximum(z, 0.0).astype(compute_dtype)
    # TODO(synk): training-mode dropout would go here (identity in eval mode).

    z = jnp.dot(h, w2_ref[...], preferred_element_type=jnp.float32) + b2_ref[...]
    h = jnp.maximum(z, 0.0).astype(compute_dtype)

    z = jnp.dot(h, w3_ref[...], preferred_element_type=jnp.float32) + b3_ref[...]
    h = jnp.maximum(z, 0.0).astype(compute_dtype)

    y = jnp.dot(h, w4_ref[...], preferred_element_type=jnp.float32) + b4_ref[...]
    o_ref[...] = y.astype(o_ref.dtype)


# ------------------------------ param padding -------------------------------

def _pad_params(params, in_features, out_features, compute_dtype):
    """Zero-pad hidden dims to 128 lanes and cast weights to the compute dtype.

    The output dim is NOT padded (lane-sparse final store is cheaper than a
    128x padded writeback).  Biases stay f32 (tiny; keeps bias-add exact)."""
    h1 = params["w1"].shape[1]
    h2 = params["w2"].shape[1]
    h3 = params["w3"].shape[1]
    h1p, h2p, h3p = (_round_up(d, _LANE) for d in (h1, h2, h3))

    def padw(a, rows, cols):
        a = jnp.pad(a, ((0, rows - a.shape[0]), (0, cols - a.shape[1])))
        return a.astype(compute_dtype)

    def padb(a, cols):
        return jnp.pad(a, ((0, 0), (0, cols - a.shape[1]))).astype(jnp.float32)

    padded = {
        "w1": padw(params["w1"], in_features, h1p), "b1": padb(params["b1"], h1p),
        "w2": padw(params["w2"], h1p, h2p),         "b2": padb(params["b2"], h2p),
        "w3": padw(params["w3"], h2p, h3p),         "b3": padb(params["b3"], h3p),
        "w4": padw(params["w4"], h3p, out_features),
        "b4": padb(params["b4"], out_features),
    }
    return padded, (h1p, h2p, h3p)


# ----------------------------- VMEM budgeting -------------------------------

def _vmem_limit_bytes():
    """Generation-aware scoped-VMEM budget (~75% of physical per-core VMEM)."""
    cap = None
    try:
        cap = getattr(pltpu.get_tpu_info(), "vmem_capacity_bytes", None)
    except Exception:
        cap = None
    if not cap:
        cap = 64 * 1024 * 1024  # conservative fallback: v7x per-core VMEM
    return int(cap) * 3 // 4    # v5e/v6e: ~96 MiB, v7x: ~48 MiB


def _vmem_tile_bytes(rows, cols, itemsize):
    """VMEM footprint of a (rows, cols) buffer: last dim tiles to 128 lanes,
    second-to-last to 8 (f32) / 16 (bf16) sublanes."""
    sub = _SUBLANE if itemsize >= 4 else _SUBLANE * (4 // itemsize)
    return _round_up(max(rows, 1), sub) * _round_up(max(cols, 1), _LANE) * itemsize


def _weight_vmem_bytes(F, h1p, h2p, h3p, out_f, w_isz, buffers):
    w = (_vmem_tile_bytes(F,   h1p,   w_isz)
         + _vmem_tile_bytes(h1p, h2p,  w_isz)
         + _vmem_tile_bytes(h2p, h3p,  w_isz)
         + _vmem_tile_bytes(h3p, out_f, w_isz))
    b = (_vmem_tile_bytes(1, h1p, 4) + _vmem_tile_bytes(1, h2p, 4)
         + _vmem_tile_bytes(1, h3p, 4) + _vmem_tile_bytes(1, out_f, 4))
    return buffers * (w + b)


def _row_vmem_bytes(F, h1p, h2p, h3p, out_f, x_isz, out_isz):
    x_row = 2 * _round_up(F, _LANE) * x_isz          # double-buffered x tile
    o_row = 2 * _round_up(out_f, _LANE) * out_isz    # double-buffered out tile
    # live intermediates in the body: f32 z + compute-dtype h per hidden layer
    h_row = sum(_round_up(d, _LANE) * (4 + x_isz) for d in (h1p, h2p, h3p))
    return x_row + o_row + h_row


def _pick_block_b(batch, F, hpads, out_f, x_isz, out_isz, vmem_limit,
                  requested=None):
    h1p, h2p, h3p = hpads
    budget = int(vmem_limit * 0.9)  # headroom for compiler-internal scratch
    # Conservative: assume double-buffered weights even when Buffered(1) is used.
    wbytes = _weight_vmem_bytes(F, h1p, h2p, h3p, out_f, x_isz, buffers=2)
    rbytes = _row_vmem_bytes(F, h1p, h2p, h3p, out_f, x_isz, out_isz)
    if wbytes + _SUBLANE * rbytes > budget:
        # TODO(synk): K-tile layer 1 instead of requiring all weights resident.
        raise ValueError(
            f"RegressionHead weights ({wbytes} B resident) do not fit the VMEM "
            f"budget ({budget} B); in_features too large for the fused kernel.")
    vmem_cap = (budget - wbytes) // rbytes
    # Aim for >= 4 grid steps so each v7x TensorCore gets >= 2 pipelined steps.
    mega_cap = _round_up(pl.cdiv(batch, 4), _SUBLANE)
    if requested is not None:
        bb = min(requested, vmem_cap)
    else:
        bb = min(1024, vmem_cap, mega_cap)
    bb = min(bb, _round_up(batch, _SUBLANE))
    return max(_SUBLANE, (bb // _SUBLANE) * _SUBLANE)


# --------------------------------- wrapper ----------------------------------

def regression_head(x, params, *, block_b=None, compute_dtype=jnp.bfloat16,
                    training=False):
    """x: (B, in_features).  params: transposed (in, out) weights, (1, n) biases.

    Returns (B, out_features) in x.dtype."""
    if training:
        # TODO(synk): training-mode dropout not implemented in the kernel.
        raise NotImplementedError(
            "RegressionHead Pallas kernel is inference-only (dropout=identity).")

    B, F = x.shape
    out_features = params["w4"].shape[1]
    out_dtype = x.dtype
    compute_dtype = jnp.dtype(compute_dtype)
    x_isz = compute_dtype.itemsize
    out_isz = jnp.dtype(out_dtype).itemsize

    padded, (h1p, h2p, h3p) = _pad_params(params, F, out_features, compute_dtype)
    x = x.astype(compute_dtype)  # halve the dominant HBM read

    vmem_limit = _vmem_limit_bytes()
    block_b = _pick_block_b(B, F, (h1p, h2p, h3p), out_features, x_isz, out_isz,
                            vmem_limit, requested=block_b)

    grid_b = pl.cdiv(B, block_b)
    b_pad = grid_b * block_b
    if b_pad != B:
        # Full tiles everywhere: the kernel never sees a ragged last tile.
        x = jnp.pad(x, ((0, b_pad - B), (0, 0)))

    weight_hbm_bytes = sum(int(a.size) * a.dtype.itemsize for a in padded.values())
    cost = pl.CostEstimate(
        flops=2 * b_pad * (F * h1p + h1p * h2p + h2p * h3p + h3p * out_features),
        transcendentals=0,
        bytes_accessed=(b_pad * F * x_isz + b_pad * out_features * out_isz
                        + weight_hbm_bytes),
    )

    def build(single_buffer_weights):
        if single_buffer_weights:
            def resident(shape):
                # Constant block index -> DMA'd once; hold in a single buffer.
                return pl.BlockSpec(shape, lambda i: (0,) * len(shape),
                                    pipeline_mode=pl.Buffered(buffer_count=1))
        else:
            def resident(shape):
                return pl.BlockSpec(shape, lambda i: (0,) * len(shape))

        in_specs = [
            pl.BlockSpec((block_b, F), lambda i: (i, 0)),
            resident(padded["w1"].shape), resident(padded["b1"].shape),
            resident(padded["w2"].shape), resident(padded["b2"].shape),
            resident(padded["w3"].shape), resident(padded["b3"].shape),
            resident(padded["w4"].shape), resident(padded["b4"].shape),
        ]
        # Narrow output block: last dim == full array dim (no 128-lane padding).
        out_spec = pl.BlockSpec((block_b, out_features), lambda i: (i, 0))

        return pl.pallas_call(
            _regression_head_kernel,
            out_shape=jax.ShapeDtypeStruct((b_pad, out_features), out_dtype),
            grid_spec=pltpu.PrefetchScalarGridSpec(
                num_scalar_prefetch=0,
                grid=(grid_b,),
                in_specs=in_specs,
                out_specs=out_spec,
            ),
            compiler_params=pltpu.CompilerParams(
                dimension_semantics=("parallel",),
                vmem_limit_bytes=vmem_limit,
            ),
            cost_estimate=cost,
        )

    args = (x,
            padded["w1"], padded["b1"], padded["w2"], padded["b2"],
            padded["w3"], padded["b3"], padded["w4"], padded["b4"])
    try:
        y_pad = build(single_buffer_weights=True)(*args)
    except Exception:
        # pl.Buffered(1) not supported on this jax version -> default buffering.
        y_pad = build(single_buffer_weights=False)(*args)

    return y_pad[:B]


# ------------------------- init + pure-JAX reference ------------------------

def init_params(key, in_features, out_features=1):
    """Deterministic synthetic init. Weights stored as (in, out) = W^T."""
    dims = [in_features, in_features // 2, in_features // 4, in_features // 8,
            out_features]
    params = {}
    keys = jax.random.split(key, 8)
    for li in range(4):
        fan_in, fan_out = dims[li], dims[li + 1]
        scale = 1.0 / jnp.sqrt(jnp.float32(fan_in))
        w = jax.random.uniform(keys[2 * li], (fan_in, fan_out),
                               minval=-scale, maxval=scale, dtype=jnp.float32)
        b = jax.random.uniform(keys[2 * li + 1], (1, fan_out),
                               minval=-scale, maxval=scale, dtype=jnp.float32)
        params[f"w{li + 1}"] = w
        params[f"b{li + 1}"] = b
    return params


def _reference(x, params, compute_dtype=jnp.bfloat16):
    """Pure-JAX mirror of the kernel's data path (bf16 operands, f32 accum)."""
    h = x.astype(compute_dtype)
    for li in range(1, 4):
        z = jnp.dot(h, params[f"w{li}"].astype(compute_dtype),
                    preferred_element_type=jnp.float32) + params[f"b{li}"]
        h = jnp.maximum(z, 0.0).astype(compute_dtype)
    y = jnp.dot(h, params["w4"].astype(compute_dtype),
                preferred_element_type=jnp.float32) + params["b4"]
    return y


if __name__ == "__main__":
    key = jax.random.PRNGKey(0)
    k_x, k_p = jax.random.split(key)

    batch = 1000          # not a multiple of the tile -> exercises tail padding
    in_features = 32      # -> 16 -> 8 -> 4 -> 1

    x = jax.random.normal(k_x, (batch, in_features), dtype=jnp.float32)
    params = init_params(k_p, in_features, out_features=1)

    y = regression_head(x, params)
    y = jax.block_until_ready(y)

    y_ref = _reference(x, params)
    assert y.shape == (batch, 1), y.shape
    err = float(jnp.max(jnp.abs(y.astype(jnp.float32) - y_ref.astype(jnp.float32))))
    assert err < 1e-3, f"max err {err}"

    print("KERNEL_OK")
</pallas_src>

<mosaic_0001>
module attributes {stable_mosaic.version = 11 : i64} {
  func.func @_regression_head_kernel(%arg0: i32, %arg1: memref<256x32xbf16, #tpu.memory_space<vmem>>, %arg2: memref<32x128xbf16, #tpu.memory_space<vmem>>, %arg3: memref<1x128xf32, #tpu.memory_space<vmem>>, %arg4: memref<128x128xbf16, #tpu.memory_space<vmem>>, %arg5: memref<1x128xf32, #tpu.memory_space<vmem>>, %arg6: memref<128x128xbf16, #tpu.memory_space<vmem>>, %arg7: memref<1x128xf32, #tpu.memory_space<vmem>>, %arg8: memref<128x1xbf16, #tpu.memory_space<vmem>>, %arg9: memref<1x1xf32, #tpu.memory_space<vmem>>, %arg10: memref<256x1xf32, #tpu.memory_space<vmem>>) attributes {dimension_semantics = [#tpu.dimension_semantics<parallel>], iteration_bounds = array<i64: 4>, scalar_prefetch = 0 : i64, scratch_operands = 0 : i64, tpu.core_type = #tpu.core_type<tc>, window_params = [{transform_indices = @transform_0, window_bounds = array<i64: 256, 32>}, {pipeline_mode = #tpu.pipeline_mode<synchronous>, transform_indices = @transform_1, window_bounds = array<i64: 32, 128>}, {pipeline_mode = #tpu.pipeline_mode<synchronous>, transform_indices = @transform_2, window_bounds = array<i64: 1, 128>}, {pipeline_mode = #tpu.pipeline_mode<synchronous>, transform_indices = @transform_3, window_bounds = array<i64: 128, 128>}, {pipeline_mode = #tpu.pipeline_mode<synchronous>, transform_indices = @transform_4, window_bounds = array<i64: 1, 128>}, {pipeline_mode = #tpu.pipeline_mode<synchronous>, transform_indices = @transform_5, window_bounds = array<i64: 128, 128>}, {pipeline_mode = #tpu.pipeline_mode<synchronous>, transform_indices = @transform_6, window_bounds = array<i64: 1, 128>}, {pipeline_mode = #tpu.pipeline_mode<synchronous>, transform_indices = @transform_7, window_bounds = array<i64: 128, 1>}, {pipeline_mode = #tpu.pipeline_mode<synchronous>, transform_indices = @transform_8, window_bounds = array<i64: 1, 1>}, {transform_indices = @transform_9, window_bounds = array<i64: 256, 1>}]} {
    %c0 = arith.constant 0 : index
    %c0_0 = arith.constant 0 : index
    %0 = vector.load %arg1[%c0, %c0_0] : memref<256x32xbf16, #tpu.memory_space<vmem>>, vector<256x32xbf16>
    %c0_1 = arith.constant 0 : index
    %c0_2 = arith.constant 0 : index
    %1 = vector.load %arg2[%c0_1, %c0_2] : memref<32x128xbf16, #tpu.memory_space<vmem>>, vector<32x128xbf16>
    %cst = arith.constant dense<0.000000e+00> : vector<256x128xf32>
    %2 = tpu.matmul %0, %1, %cst {dimension_numbers = #tpu.dot_dimension_numbers<[1], [0], [0], [1], [0, 0, 1, 1], [], []>} : vector<256x32xbf16>, vector<32x128xbf16>, vector<256x128xf32> -> vector<256x128xf32>
    %c0_3 = arith.constant 0 : index
    %c0_4 = arith.constant 0 : index
    %3 = vector.load %arg3[%c0_3, %c0_4] : memref<1x128xf32, #tpu.memory_space<vmem>>, vector<1x128xf32>
    %4 = vector.broadcast %3 : vector<1x128xf32> to vector<256x128xf32>
    %5 = arith.addf %2, %4 : vector<256x128xf32>
    %cst_5 = arith.constant 0.000000e+00 : f32
    %6 = vector.broadcast %cst_5 : f32 to vector<256x128xf32>
    %7 = arith.maximumf %5, %6 : vector<256x128xf32>
    %8 = arith.truncf %7 : vector<256x128xf32> to vector<256x128xbf16>
    %c0_6 = arith.constant 0 : index
    %c0_7 = arith.constant 0 : index
    %9 = vector.load %arg4[%c0_6, %c0_7] : memref<128x128xbf16, #tpu.memory_space<vmem>>, vector<128x128xbf16>
    %cst_8 = arith.constant dense<0.000000e+00> : vector<256x128xf32>
    %10 = tpu.matmul %8, %9, %cst_8 {dimension_numbers = #tpu.dot_dimension_numbers<[1], [0], [0], [1], [0, 0, 1, 1], [], []>} : vector<256x128xbf16>, vector<128x128xbf16>, vector<256x128xf32> -> vector<256x128xf32>
    %c0_9 = arith.constant 0 : index
    %c0_10 = arith.constant 0 : index
    %11 = vector.load %arg5[%c0_9, %c0_10] : memref<1x128xf32, #tpu.memory_space<vmem>>, vector<1x128xf32>
    %12 = vector.broadcast %11 : vector<1x128xf32> to vector<256x128xf32>
    %13 = arith.addf %10, %12 : vector<256x128xf32>
    %cst_11 = arith.constant 0.000000e+00 : f32
    %14 = vector.broadcast %cst_11 : f32 to vector<256x128xf32>
    %15 = arith.maximumf %13, %14 : vector<256x128xf32>
    %16 = arith.truncf %15 : vector<256x128xf32> to vector<256x128xbf16>
    %c0_12 = arith.constant 0 : index
    %c0_13 = arith.constant 0 : index
    %17 = vector.load %arg6[%c0_12, %c0_13] : memref<128x128xbf16, #tpu.memory_space<vmem>>, vector<128x128xbf16>
    %cst_14 = arith.constant dense<0.000000e+00> : vector<256x128xf32>
    %18 = tpu.matmul %16, %17, %cst_14 {dimension_numbers = #tpu.dot_dimension_numbers<[1], [0], [0], [1], [0, 0, 1, 1], [], []>} : vector<256x128xbf16>, vector<128x128xbf16>, vector<256x128xf32> -> vector<256x128xf32>
    %c0_15 = arith.constant 0 : index
    %c0_16 = arith.constant 0 : index
    %19 = vector.load %arg7[%c0_15, %c0_16] : memref<1x128xf32, #tpu.memory_space<vmem>>, vector<1x128xf32>
    %20 = vector.broadcast %19 : vector<1x128xf32> to vector<256x128xf32>
    %21 = arith.addf %18, %20 : vector<256x128xf32>
    %cst_17 = arith.constant 0.000000e+00 : f32
    %22 = vector.broadcast %cst_17 : f32 to vector<256x128xf32>
    %23 = arith.maximumf %21, %22 : vector<256x128xf32>
    %24 = arith.truncf %23 : vector<256x128xf32> to vector<256x128xbf16>
    %c0_18 = arith.constant 0 : index
    %c0_19 = arith.constant 0 : index
    %25 = vector.load %arg8[%c0_18, %c0_19] : memref<128x1xbf16, #tpu.memory_space<vmem>>, vector<128x1xbf16>
    %cst_20 = arith.constant dense<0.000000e+00> : vector<256x1xf32>
    %26 = tpu.matmul %24, %25, %cst_20 {dimension_numbers = #tpu.dot_dimension_numbers<[1], [0], [0], [1], [0, 0, 1, 1], [], []>} : vector<256x128xbf16>, vector<128x1xbf16>, vector<256x1xf32> -> vector<256x1xf32>
    %c0_21 = arith.constant 0 : index
    %c0_22 = arith.constant 0 : index
    %27 = vector.load %arg9[%c0_21, %c0_22] : memref<1x1xf32, #tpu.memory_space<vmem>>, vector<1x1xf32>
    %28 = vector.broadcast %27 : vector<1x1xf32> to vector<256x1xf32>
    %29 = arith.addf %26, %28 : vector<256x1xf32>
    %c0_23 = arith.constant 0 : index
    %c0_24 = arith.constant 0 : index
    %30 = vector.load %arg10[%c0_23, %c0_24] : memref<256x1xf32, #tpu.memory_space<vmem>>, vector<256x1xf32>
    tpu.vector_store %arg10[%c0_23, %c0_24], %29 {strides = array<i32>} : memref<256x1xf32, #tpu.memory_space<vmem>>, vector<256x1xf32>,
    return
  }
  func.func @transform_0(%arg0: i32) -> (i32, i32) {
    %c0_i32 = arith.constant 0 : i32
    %c0_i32_0 = arith.constant 0 : i32
    return %arg0, %c0_i32 : i32, i32
  }
  func.func @transform_1(%arg0: i32) -> (i32, i32) {
    %c0_i32 = arith.constant 0 : i32
    %c0_i32_0 = arith.constant 0 : i32
    %c0_i32_1 = arith.constant 0 : i32
    return %c0_i32, %c0_i32_0 : i32, i32
  }
  func.func @transform_2(%arg0: i32) -> (i32, i32) {
    %c0_i32 = arith.constant 0 : i32
    %c0_i32_0 = arith.constant 0 : i32
    %c0_i32_1 = arith.constant 0 : i32
    return %c0_i32, %c0_i32_0 : i32, i32
  }
  func.func @transform_3(%arg0: i32) -> (i32, i32) {
    %c0_i32 = arith.constant 0 : i32
    %c0_i32_0 = arith.constant 0 : i32
    %c0_i32_1 = arith.constant 0 : i32
    return %c0_i32, %c0_i32_0 : i32, i32
  }
  func.func @transform_4(%arg0: i32) -> (i32, i32) {
    %c0_i32 = arith.constant 0 : i32
    %c0_i32_0 = arith.constant 0 : i32
    %c0_i32_1 = arith.constant 0 : i32
    return %c0_i32, %c0_i32_0 : i32, i32
  }
  func.func @transform_5(%arg0: i32) -> (i32, i32) {
    %c0_i32 = arith.constant 0 : i32
    %c0_i32_0 = arith.constant 0 : i32
    %c0_i32_1 = arith.constant 0 : i32
    return %c0_i32, %c0_i32_0 : i32, i32
  }
  func.func @transform_6(%arg0: i32) -> (i32, i32) {
    %c0_i32 = arith.constant 0 : i32
    %c0_i32_0 = arith.constant 0 : i32
    %c0_i32_1 = arith.constant 0 : i32
    return %c0_i32, %c0_i32_0 : i32, i32
  }
  func.func @transform_7(%arg0: i32) -> (i32, i32) {
    %c0_i32 = arith.constant 0 : i32
    %c0_i32_0 = arith.constant 0 : i32
    %c0_i32_1 = arith.constant 0 : i32
    return %c0_i32, %c0_i32_0 : i32, i32
  }
  func.func @transform_8(%arg0: i32) -> (i32, i32) {
    %c0_i32 = arith.constant 0 : i32
    %c0_i32_0 = arith.constant 0 : i32
    %c0_i32_1 = arith.constant 0 : i32
    return %c0_i32, %c0_i32_0 : i32, i32
  }
  func.func @transform_9(%arg0: i32) -> (i32, i32) {
    %c0_i32 = arith.constant 0 : i32
    %c0_i32_0 = arith.constant 0 : i32
    return %arg0, %c0_i32 : i32, i32
  }
}

module attributes {stable_mosaic.version = 11 : i64} {
  func.func @_regression_head_kernel(%arg0: i32, %arg1: memref<256x32xbf16, #tpu.memory_space<vmem>>, %arg2: memref<32x128xbf16, #tpu.memory_space<vmem>>, %arg3: memref<1x128xf32, #tpu.memory_space<vmem>>, %arg4: memref<128x128xbf16, #tpu.memory_space<vmem>>, %arg5: memref<1x128xf32, #tpu.memory_space<vmem>>, %arg6: memref<128x128xbf16, #tpu.memory_space<vmem>>, %arg7: memref<1x128xf32, #tpu.memory_space<vmem>>, %arg8: memref<128x1xbf16, #tpu.memory_space<vmem>>, %arg9: memref<1x1xf32, #tpu.memory_space<vmem>>, %arg10: memref<256x1xf32, #tpu.memory_space<vmem>>) attributes {dimension_semantics = [#tpu.dimension_semantics<parallel>], iteration_bounds = array<i64: 4>, scalar_prefetch = 0 : i64, scratch_operands = 0 : i64, tpu.core_type = #tpu.core_type<tc>, window_params = [{transform_indices = @transform_0, window_bounds = array<i64: 256, 32>}, {pipeline_mode = #tpu.pipeline_mode<synchronous>, transform_indices = @transform_1, window_bounds = array<i64: 32, 128>}, {pipeline_mode = #tpu.pipeline_mode<synchronous>, transform_indices = @transform_2, window_bounds = array<i64: 1, 128>}, {pipeline_mode = #tpu.pipeline_mode<synchronous>, transform_indices = @transform_3, window_bounds = array<i64: 128, 128>}, {pipeline_mode = #tpu.pipeline_mode<synchronous>, transform_indices = @transform_4, window_bounds = array<i64: 1, 128>}, {pipeline_mode = #tpu.pipeline_mode<synchronous>, transform_indices = @transform_5, window_bounds = array<i64: 128, 128>}, {pipeline_mode = #tpu.pipeline_mode<synchronous>, transform_indices = @transform_6, window_bounds = array<i64: 1, 128>}, {pipeline_mode = #tpu.pipeline_mode<synchronous>, transform_indices = @transform_7, window_bounds = array<i64: 128, 1>}, {pipeline_mode = #tpu.pipeline_mode<synchronous>, transform_indices = @transform_8, window_bounds = array<i64: 1, 1>}, {transform_indices = @transform_9, window_bounds = array<i64: 256, 1>}]} {
    %c0 = arith.constant 0 : index
    %c0_0 = arith.constant 0 : index
    %0 = vector.load %arg1[%c0, %c0_0] : memref<256x32xbf16, #tpu.memory_space<vmem>>, vector<256x32xbf16>
    %c0_1 = arith.constant 0 : index
    %c0_2 = arith.constant 0 : index
    %1 = vector.load %arg2[%c0_1, %c0_2] : memref<32x128xbf16, #tpu.memory_space<vmem>>, vector<32x128xbf16>
    %cst = arith.constant dense<0.000000e+00> : vector<256x128xf32>
    %2 = tpu.matmul %0, %1, %cst {dimension_numbers = #tpu.dot_dimension_numbers<[1], [0], [0], [1], [0, 0, 1, 1], [], []>} : vector<256x32xbf16>, vector<32x128xbf16>, vector<256x128xf32> -> vector<256x128xf32>
    %c0_3 = arith.constant 0 : index
    %c0_4 = arith.constant 0 : index
    %3 = vector.load %arg3[%c0_3, %c0_4] : memref<1x128xf32, #tpu.memory_space<vmem>>, vector<1x128xf32>
    %4 = vector.broadcast %3 : vector<1x128xf32> to vector<256x128xf32>
    %5 = arith.addf %2, %4 : vector<256x128xf32>
    %cst_5 = arith.constant 0.000000e+00 : f32
    %6 = vector.broadcast %cst_5 : f32 to vector<256x128xf32>
    %7 = arith.maximumf %5, %6 : vector<256x128xf32>
    %8 = arith.truncf %7 : vector<256x128xf32> to vector<256x128xbf16>
    %c0_6 = arith.constant 0 : index
    %c0_7 = arith.constant 0 : index
    %9 = vector.load %arg4[%c0_6, %c0_7] : memref<128x128xbf16, #tpu.memory_space<vmem>>, vector<128x128xbf16>
    %cst_8 = arith.constant dense<0.000000e+00> : vector<256x128xf32>
    %10 = tpu.matmul %8, %9, %cst_8 {dimension_numbers = #tpu.dot_dimension_numbers<[1], [0], [0], [1], [0, 0, 1, 1], [], []>} : vector<256x128xbf16>, vector<128x128xbf16>, vector<256x128xf32> -> vector<256x128xf32>
    %c0_9 = arith.constant 0 : index
    %c0_10 = arith.constant 0 : index
    %11 = vector.load %arg5[%c0_9, %c0_10] : memref<1x128xf32, #tpu.memory_space<vmem>>, vector<1x128xf32>
    %12 = vector.broadcast %11 : vector<1x128xf32> to vector<256x128xf32>
    %13 = arith.addf %10, %12 : vector<256x128xf32>
    %cst_11 = arith.constant 0.000000e+00 : f32
    %14 = vector.broadcast %cst_11 : f32 to vector<256x128xf32>
    %15 = arith.maximumf %13, %14 : vector<256x128xf32>
    %16 = arith.truncf %15 : vector<256x128xf32> to vector<256x128xbf16>
    %c0_12 = arith.constant 0 : index
    %c0_13 = arith.constant 0 : index
    %17 = vector.load %arg6[%c0_12, %c0_13] : memref<128x128xbf16, #tpu.memory_space<vmem>>, vector<128x128xbf16>
    %cst_14 = arith.constant dense<0.000000e+00> : vector<256x128xf32>
    %18 = tpu.matmul %16, %17, %cst_14 {dimension_numbers = #tpu.dot_dimension_numbers<[1], [0], [0], [1], [0, 0, 1, 1], [], []>} : vector<256x128xbf16>, vector<128x128xbf16>, vector<256x128xf32> -> vector<256x128xf32>
    %c0_15 = arith.constant 0 : index
    %c0_16 = arith.constant 0 : index
    %19 = vector.load %arg7[%c0_15, %c0_16] : memref<1x128xf32, #tpu.memory_space<vmem>>, vector<1x128xf32>
    %20 = vector.broadcast %19 : vector<1x128xf32> to vector<256x128xf32>
    %21 = arith.addf %18, %20 : vector<256x128xf32>
    %cst_17 = arith.constant 0.000000e+00 : f32
    %22 = vector.broadcast %cst_17 : f32 to vector<256x128xf32>
    %23 = arith.maximumf %21, %22 : vector<256x128xf32>
    %24 = arith.truncf %23 : vector<256x128xf32> to vector<256x128xbf16>
    %c0_18 = arith.constant 0 : index
    %c0_19 = arith.constant 0 : index
    %25 = vector.load %arg8[%c0_18, %c0_19] : memref<128x1xbf16, #tpu.memory_space<vmem>>, vector<128x1xbf16>
    %cst_20 = arith.constant dense<0.000000e+00> : vector<256x1xf32>
    %26 = tpu.matmul %24, %25, %cst_20 {dimension_numbers = #tpu.dot_dimension_numbers<[1], [0], [0], [1], [0, 0, 1, 1], [], []>} : vector<256x128xbf16>, vector<128x1xbf16>, vector<256x1xf32> -> vector<256x1xf32>
    %c0_21 = arith.constant 0 : index
    %c0_22 = arith.constant 0 : index
    %27 = vector.load %arg9[%c0_21, %c0_22] : memref<1x1xf32, #tpu.memory_space<vmem>>, vector<1x1xf32>
    %28 = vector.broadcast %27 : vector<1x1xf32> to vector<256x1xf32>
    %29 = arith.addf %26, %28 : vector<256x1xf32>
    %c0_23 = arith.constant 0 : index
    %c0_24 = arith.constant 0 : index
    %30 = vector.load %arg10[%c0_23, %c0_24] : memref<256x1xf32, #tpu.memory_space<vmem>>, vector<256x1xf32>
    tpu.vector_store %arg10[%c0_23, %c0_24], %29 {strides = array<i32>} : memref<256x1xf32, #tpu.memory_space<vmem>>, vector<256x1xf32>,
    return
  }
  func.func @transform_0(%arg0: i32) -> (i32, i32) {
    %c0_i32 = arith.constant 0 : i32
    %c0_i32_0 = arith.constant 0 : i32
    return %arg0, %c0_i32 : i32, i32
  }
  func.func @transform_1(%arg0: i32) -> (i32, i32) {
    %c0_i32 = arith.constant 0 : i32
    %c0_i32_0 = arith.constant 0 : i32
    %c0_i32_1 = arith.constant 0 : i32
    return %c0_i32, %c0_i32_0 : i32, i32
  }
  func.func @transform_2(%arg0: i32) -> (i32, i32) {
    %c0_i32 = arith.constant 0 : i32
    %c0_i32_0 = arith.constant 0 : i32
    %c0_i32_1 = arith.constant 0 : i32
    return %c0_i32, %c0_i32_0 : i32, i32
  }
  func.func @transform_3(%arg0: i32) -> (i32, i32) {
    %c0_i32 = arith.constant 0 : i32
    %c0_i32_0 = arith.constant 0 : i32
    %c0_i32_1 = arith.constant 0 : i32
    return %c0_i32, %c0_i32_0 : i32, i32
  }
  func.func @transform_4(%arg0: i32) -> (i32, i32) {
    %c0_i32 = arith.constant 0 : i32
    %c0_i32_0 = arith.constant 0 : i32
    %c0_i32_1 = arith.constant 0 : i32
    return %c0_i32, %c0_i32_0 : i32, i32
  }
  func.func @transform_5(%arg0: i32) -> (i32, i32) {
    %c0_i32 = arith.constant 0 : i32
    %c0_i32_0 = arith.constant 0 : i32
    %c0_i32_1 = arith.constant 0 : i32
    return %c0_i32, %c0_i32_0 : i32, i32
  }
  func.func @transform_6(%arg0: i32) -> (i32, i32) {
    %c0_i32 = arith.constant 0 : i32
    %c0_i32_0 = arith.constant 0 : i32
    %c0_i32_1 = arith.constant 0 : i32
    return %c0_i32, %c0_i32_0 : i32, i32
  }
  func.func @transform_7(%arg0: i32) -> (i32, i32) {
    %c0_i32 = arith.constant 0 : i32
    %c0_i32_0 = arith.constant 0 : i32
    %c0_i32_1 = arith.constant 0 : i32
    return %c0_i32, %c0_i32_0 : i32, i32
  }
  func.func @transform_8(%arg0: i32) -> (i32, i32) {
    %c0_i32 = arith.constant 0 : i32
    %c0_i32_0 = arith.constant 0 : i32
    %c0_i32_1 = arith.constant 0 : i32
    return %c0_i32, %c0_i32_0 : i32, i32
  }
  func.func @transform_9(%arg0: i32) -> (i32, i32) {
    %c0_i32 = arith.constant 0 : i32
    %c0_i32_0 = arith.constant 0 : i32
    return %arg0, %c0_i32 : i32, i32
  }
}

</mosaic_0001>

<bundles_post_ra>
// kernel: tpu_custom_call.1
= control target key start
LH: loop header
LB: loop body
LE: loop exit
PB: predicated region body
PF: predicated region fallthrough
CT: control target
= control target key end

     0   :  { %s1623_s11 = smov 0   ;;  %s1967_s0 = inlined_call_operand.vmem [shape: bf16[1024,32], index: 0, kind: input, shape index: {}]   ;;  %s1968_s1 = inlined_call_operand.vmem [shape: bf16[32,128], index: 1, kind: input, shape index: {}]   ;;  %s1969_s2 = inlined_call_operand.vmem [shape: f32[1,128], index: 2, kind: input, shape index: {}]   ;;  %s1970_s3 = inlined_call_operand.vmem [shape: bf16[128,128], index: 3, kind: input, shape index: {}]   ;;  %s1971_s4 = inlined_call_operand.vmem [shape: f32[1,128], index: 4, kind: input, shape index: {}]   ;;  %s1972_s5 = inlined_call_operand.vmem [shape: bf16[128,128], index: 5, kind: input, shape index: {}]   ;;  %s1973_s6 = inlined_call_operand.vmem [shape: f32[1,128], index: 6, kind: input, shape index: {}]   ;;  %s1974_s7 = inlined_call_operand.vmem [shape: bf16[128,1], index: 7, kind: input, shape index: {}]   ;;  %s1975_s8 = inlined_call_operand.<no memory space> [shape: f32[1,1], index: 8, kind: input, shape index: {}]   ;;  %s1976_s9 = inlined_call_operand.vmem [shape: f32[1024,1], index: 9, kind: output, shape index: {}]  }
   0x1   :  { %v14_v0 = vstv %s1975_s8 }
   0x2   :  { %15 = vst [vmem:[#allocation2] sm:$0x1] %v14_v0 }
   0x3 LB: > { %s1313_s12 = sadd.s32 4294967295, %s1568_s11   ;;  %p1317_p0 = scmp.ge.s32.totalorder %s1568_s11, 1  ;;  %s1568_s11 = sphi %s1623_s11, %s21_s11  }
   0x4   : > { %p290_p1 = scmp.lt.s32.totalorder %s1568_s11, 5 }
   0x6   : > { %p291_p2 = pnand %p1317_p0, %p290_p1 }
   0x7   : > { %s1318_s8 = sshll.u32 (!%p291_p2), %s1313_s12, 5 }
   0x8   : > { %294 = sbr.rel (%p291_p2) target bundleno = 830 (0x33e), region = 56  ;;  %p327_p3 = scmp.lt.s32.totalorder (!%p291_p2), %s1318_s8, 127 }
   0xd   : > { %v1525_v1 = vld [vmem:[%s1968_s1 + $0x8] sm:$0xff]  ;;  %v1524_v2 = vld [vmem:[%s1968_s1] sm:$0xff]  ;;  %s1978_s8 = smov (!%p327_p3, %s1318_s8), 127  ;;  %vm471_vm0 = vcmask 261120   ;;  %v1533_v8 = vld [vmem:[%s1970_s3 + $0x38] sm:$0xff]  ;;  %vm1224_vm1 = vcmask 7168  }
   0xe   : > { %526 = vmatpush.bf16.msra.mxu0 %v1525_v1  ;;  %s1319_s17 = sshll.u32 %s1978_s8, 2  ;;  %725 = vmatpush.bf16.msra.mxu1 %v1533_v8  ;;  %v1532_v10 = vld [vmem:[%s1970_s3 + $0x30] sm:$0xff]  ;;  %v1531_v11 = vld [vmem:[%s1970_s3 + $0x28] sm:$0xff]  ;;  %v1530_v12 = vld [vmem:[%s1970_s3 + $0x20] sm:$0xff] }
   0xf   : > { %s1643_s20 = scalar_lea.vmem %s1967_s0, %s1319_s17  ;;  %v1529_v13 = vld [vmem:[%s1970_s3 + $0x18] sm:$0xff]  ;;  %v1528_v15 = vld [vmem:[%s1970_s3 + $0x10] sm:$0xff]  ;;  %v1527_v16 = vld [vmem:[%s1970_s3 + $0x8] sm:$0xff] }
  0x10   : > { %v1508_v3 = vld [vmem:[%s1643_s20] sm:$0xff]  ;;  %v1509_v4 = vld [vmem:[%s1643_s20 + $0x8] sm:$0xff]  ;;  %v1510_v5 = vld [vmem:[%s1643_s20 + $0x10] sm:$0xff] }
  0x11   : > { %v1511_v6 = vld [vmem:[%s1643_s20 + $0x18] sm:$0xff]  ;;  %v1512_v7 = vld [vmem:[%s1643_s20 + $0x20] sm:$0xff]  ;;  %v1513_v9 = vld [vmem:[%s1643_s20 + $0x28] sm:$0xff] }
  0x12   : > { %527 = vmatpush.bf16.msra.mxu0 %v1524_v2  ;;  %726 = vmatpush.bf16.msra.mxu1 %v1532_v10  ;;  %v1514_v14 = vld [vmem:[%s1643_s20 + $0x30] sm:$0xff]  ;;  %v1526_v17 = vld [vmem:[%s1970_s3] sm:$0xff]  ;;  %v1515_v18 = vld [vmem:[%s1643_s20 + $0x38] sm:$0xff] }
  0x13   : > { %v1516_v19 = vld [vmem:[%s1643_s20 + $0x40] sm:$0xff]  ;;  %v1517_v28 = vld [vmem:[%s1643_s20 + $0x48] sm:$0xff]  ;;  %v1518_v36 = vld [vmem:[%s1643_s20 + $0x50] sm:$0xff] }
  0x14   : > { %v1689_v21 = vld [vmem:[%s1969_s2] ss:$0 sm:$0xff]  ;;  %v1519_v44 = vld [vmem:[%s1643_s20 + $0x58] sm:$0xff]  ;;  %v1521_v60 = vld [vmem:[%s1643_s20 + $0x68] sm:$0xff] }
  0x15   : > { %1394 = vmatmul.msk.bf16.vlgmr.msra.gmra.mxu0 %vm471_vm0, %v1508_v3  ;;  %v1520_v52 = vld [vmem:[%s1643_s20 + $0x60] sm:$0xff]  ;;  %v1541_v1 = vld [vmem:[%s1972_s5 + $0x38] sm:$0xff]  ;;  %v1539_v8 = vld [vmem:[%s1972_s5 + $0x28] sm:$0xff] }
  0x16   : > { %727 = vmatpush.bf16.msra.mxu1 %v1531_v11  ;;  %930 = vmatpush.bf16.msra.mxu2 %v1541_v1 }
  0x1a   : > { %728 = vmatpush.bf16.msra.mxu1 %v1530_v12 }
  0x1e   : > { %729 = vmatpush.bf16.msra.mxu1 %v1529_v13  ;;  %v1537_v13 = vld [vmem:[%s1972_s5 + $0x18] sm:$0xff] }
  0x22   : > { %730 = vmatpush.bf16.msra.mxu1 %v1528_v15 }
  0x25   : > { %1395 = vmatmul.msk.bf16.gmra.mxu0 %vm471_vm0, %v1509_v4 }
  0x26   : > { %731 = vmatpush.bf16.msra.mxu1 %v1527_v16 }
  0x2a   : > { %732 = vmatpush.bf16.msra.mxu1 %v1526_v17  ;;  %v1536_v17 = vld [vmem:[%s1972_s5 + $0x10] sm:$0xff] }
  0x35   : > { %1396 = vmatmul.msk.bf16.gmra.mxu0 %vm471_vm0, %v1510_v5  ;;  %v1540_v5 = vld [vmem:[%s1972_s5 + $0x30] sm:$0xff] }
  0x36   : > { %931 = vmatpush.bf16.msra.mxu2 %v1540_v5 }
  0x3a   : > { %932 = vmatpush.bf16.msra.mxu2 %v1539_v8 }
  0x45   : > { %1397 = vmatmul.msk.bf16.gmra.mxu0 %vm471_vm0, %v1511_v6  ;;  %v1522_v6 = vld [vmem:[%s1643_s20 + $0x70] sm:$0xff] }
  0x55   : > { %1398 = vmatmul.msk.bf16.gmra.mxu0 %vm471_vm0, %v1512_v7 }
  0x65   : > { %1399 = vmatmul.msk.bf16.gmra.mxu0 %vm471_vm0, %v1513_v9  ;;  %v1538_v9 = vld [vmem:[%s1972_s5 + $0x20] sm:$0xff] }
  0x66   : > { %933 = vmatpush.bf16.msra.mxu2 %v1538_v9 }
  0x6a   : > { %934 = vmatpush.bf16.msra.mxu2 %v1537_v13 }
  0x6e   : > { %935 = vmatpush.bf16.msra.mxu2 %v1536_v17 }
  0x75   : > { %1400 = vmatmul.msk.bf16.gmra.mxu0 %vm471_vm0, %v1514_v14 }
  0x85   : > { %1401 = vmatmul.msk.bf16.gmra.mxu0 %vm471_vm0, %v1515_v18  ;;  %v1523_v18 = vld [vmem:[%s1643_s20 + $0x78] sm:$0xff]  ;;  %s1321_s20 = sshll.u32 %s1978_s8, 3 }
  0x86   : > { %s1852_s18 = scalar_lea.vmem %s1976_s9, %s1321_s20 }
  0x92   : > { %v529_v20 = vpop.f32.mrf.mxu0 }
  0x93   : > { %v530_v22 = vadd.f32 %v1689_v21, %v529_v20  ;;  %v1535_v20 = vld [vmem:[%s1972_s5 + $0x8] sm:$0xff] }
  0x94   : > { %936 = vmatpush.bf16.msra.mxu2 %v1535_v20 }
  0x95   : > { %1402 = vmatmul.msk.bf16.gmra.mxu0 %vm471_vm0, %v1516_v19  ;;  %v609_v25 = vmax.f32 %v530_v22, 0.0  ;;  %v1534_v22 = vld [vmem:[%s1972_s5] sm:$0xff] }
  0x98   : > { %937 = vmatpush.bf16.msra.mxu2 %v1534_v22 }
  0x9a   : > { %v531_v23 = vpop.f32.mrf.mxu0 }
  0x9b   : > { %v532_v24 = vadd.f32 %v1689_v21, %v531_v23 }
  0x9d   : > { %v610_v26 = vmax.f32 %v532_v24, 0.0 }
  0x9f   : > { %v641_v27 = vpack.c.bf16 %v610_v26, %v609_v25 }
  0xa1   : > { %733 = vmatmul.bf16.vlgmr.msra.gmra.mxu1 %v641_v27 }
  0xa2   : > { %v534_v29 = vpop.f32.mrf.mxu0 }
  0xa3   : > { %v535_v30 = vadd.f32 %v1689_v21, %v534_v29 }
  0xa5   : > { %1403 = vmatmul.msk.bf16.gmra.mxu0 %vm471_vm0, %v1517_v28  ;;  %v611_v33 = vmax.f32 %v535_v30, 0.0 }
  0xaa   : > { %v536_v31 = vpop.f32.mrf.mxu0 }
  0xab   : > { %v537_v32 = vadd.f32 %v1689_v21, %v536_v31 }
  0xad   : > { %v612_v34 = vmax.f32 %v537_v32, 0.0 }
  0xaf   : > { %v642_v35 = vpack.c.bf16 %v612_v34, %v611_v33 }
  0xb1   : > { %738 = vmatmul.bf16.gmra.mxu1 %v642_v35 }
  0xb2   : > { %v539_v37 = vpop.f32.mrf.mxu0 }
  0xb3   : > { %v540_v38 = vadd.f32 %v1689_v21, %v539_v37  ;;  %v1751_v37 = vld [vmem:[%s1971_s4] ss:$0 sm:$0xff] }
  0xb5   : > { %1404 = vmatmul.msk.bf16.gmra.mxu0 %vm471_vm0, %v1518_v36  ;;  %v613_v41 = vmax.f32 %v540_v38, 0.0 }
  0xba   : > { %v541_v39 = vpop.f32.mrf.mxu0 }
  0xbb   : > { %v542_v40 = vadd.f32 %v1689_v21, %v541_v39 }
  0xbd   : > { %v614_v42 = vmax.f32 %v542_v40, 0.0 }
  0xbf   : > { %v643_v43 = vpack.c.bf16 %v614_v42, %v613_v41 }
  0xc1   : > { %743 = vmatmul.bf16.gmra.mxu1 %v643_v43 }
  0xc2   : > { %v544_v45 = vpop.f32.mrf.mxu0 }
  0xc3   : > { %v545_v46 = vadd.f32 %v1689_v21, %v544_v45 }
  0xc5   : > { %1405 = vmatmul.msk.bf16.gmra.mxu0 %vm471_vm0, %v1519_v44  ;;  %v615_v49 = vmax.f32 %v545_v46, 0.0 }
  0xca   : > { %v546_v47 = vpop.f32.mrf.mxu0 }
  0xcb   : > { %v547_v48 = vadd.f32 %v1689_v21, %v546_v47 }
  0xcd   : > { %v616_v50 = vmax.f32 %v547_v48, 0.0 }
  0xcf   : > { %v644_v51 = vpack.c.bf16 %v616_v50, %v615_v49 }
  0xd1   : > { %748 = vmatmul.bf16.gmra.mxu1 %v644_v51 }
  0xd2   : > { %v549_v53 = vpop.f32.mrf.mxu0 }
  0xd3   : > { %v550_v54 = vadd.f32 %v1689_v21, %v549_v53 }
  0xd5   : > { %1406 = vmatmul.msk.bf16.gmra.mxu0 %vm471_vm0, %v1520_v52  ;;  %v617_v57 = vmax.f32 %v550_v54, 0.0 }
  0xda   : > { %v551_v55 = vpop.f32.mrf.mxu0 }
  0xdb   : > { %v552_v56 = vadd.f32 %v1689_v21, %v551_v55 }
  0xdd   : > { %v618_v58 = vmax.f32 %v552_v56, 0.0 }
  0xdf   : > { %v645_v59 = vpack.c.bf16 %v618_v58, %v617_v57 }
  0xe1   : > { %753 = vmatmul.bf16.gmra.mxu1 %v645_v59 }
  0xe2   : > { %v554_v61 = vpop.f32.mrf.mxu0 }
  0xe3   : > { %v555_v62 = vadd.f32 %v1689_v21, %v554_v61 }
  0xe5   : > { %1407 = vmatmul.msk.bf16.gmra.mxu0 %vm471_vm0, %v1521_v60  ;;  %v619_v2 = vmax.f32 %v555_v62, 0.0 }
  0xea   : > { %v556_v63 = vpop.f32.mrf.mxu0 }
  0xeb   : > { %v557_v0 = vadd.f32 %v1689_v21, %v556_v63 }
  0xed   : > { %v620_v3 = vmax.f32 %v557_v0, 0.0 }
  0xef   : > { %v646_v4 = vpack.c.bf16 %v620_v3, %v619_v2 }
  0xf1   : > { %758 = vmatmul.bf16.gmra.mxu1 %v646_v4 }
  0xf2   : > { %v559_v7 = vpop.f32.mrf.mxu0 }
  0xf3   : > { %v560_v10 = vadd.f32 %v1689_v21, %v559_v7 }
  0xf5   : > { %1408 = vmatmul.msk.bf16.gmra.mxu0 %vm471_vm0, %v1522_v6  ;;  %v621_v14 = vmax.f32 %v560_v10, 0.0 }
  0xfa   : > { %v561_v11 = vpop.f32.mrf.mxu0 }
  0xfb   : > { %v562_v12 = vadd.f32 %v1689_v21, %v561_v11 }
  0xfd   : > { %v622_v15 = vmax.f32 %v562_v12, 0.0 }
  0xff   : > { %v647_v16 = vpack.c.bf16 %v622_v15, %v621_v14 }
 0x101   : > { %763 = vmatmul.bf16.gmra.mxu1 %v647_v16 }
 0x102   : > { %v564_v19 = vpop.f32.mrf.mxu0 }
 0x103   : > { %v565_v23 = vadd.f32 %v1689_v21, %v564_v19 }
 0x105   : > { %1409 = vmatmul.msk.bf16.gmra.mxu0 %vm471_vm0, %v1523_v18  ;;  %v623_v26 = vmax.f32 %v565_v23, 0.0 }
 0x10a   : > { %v566_v24 = vpop.f32.mrf.mxu0 }
 0x10b   : > { %v567_v25 = vadd.f32 %v1689_v21, %v566_v24 }
 0x10d   : > { %v624_v27 = vmax.f32 %v567_v25, 0.0 }
 0x10f   : > { %v648_v28 = vpack.c.bf16 %v624_v27, %v623_v26 }
 0x111   : > { %768 = vmatmul.bf16.gmra.mxu1 %v648_v28 }
 0x112   : > { %v569_v29 = vpop.f32.mrf.mxu0 }
 0x113   : > { %v570_v30 = vadd.f32 %v1689_v21, %v569_v29 }
 0x115   : > { %v625_v33 = vmax.f32 %v570_v30, 0.0 }
 0x11a   : > { %v571_v31 = vpop.f32.mrf.mxu0 }
 0x11b   : > { %v572_v32 = vadd.f32 %v1689_v21, %v571_v31 }
 0x11d   : > { %v626_v34 = vmax.f32 %v572_v32, 0.0 }
 0x11e   : > { %v734_v35 = vpop.f32.mrf.mxu1 }
 0x11f   : > { %v649_v36 = vpack.c.bf16 %v626_v34, %v625_v33  ;;  %v735_v39 = vadd.f32 %v1751_v37, %v734_v35 }
 0x121   : > { %773 = vmatmul.bf16.gmra.mxu1 %v649_v36  ;;  %v814_v42 = vmax.f32 %v735_v39, 0.0 }
 0x122   : > { %v574_v38 = vpop.f32.mrf.mxu0 }
 0x123   : > { %v575_v43 = vadd.f32 %v1689_v21, %v574_v38 }
 0x125   : > { %v627_v48 = vmax.f32 %v575_v43, 0.0 }
 0x126   : > { %v736_v40 = vpop.f32.mrf.mxu1 }
 0x127   : > { %v737_v41 = vadd.f32 %v1751_v37, %v736_v40 }
 0x129   : > { %v815_v44 = vmax.f32 %v737_v41, 0.0 }
 0x12a   : > { %v576_v45 = vpop.f32.mrf.mxu0 }
 0x12b   : > { %v577_v46 = vadd.f32 %v1689_v21, %v576_v45  ;;  %v846_v47 = vpack.c.bf16 %v815_v44, %v814_v42 }
 0x12d   : > { %v628_v49 = vmax.f32 %v577_v46, 0.0  ;;  %938 = vmatmul.bf16.vlgmr.msra.gmra.mxu2 %v846_v47 }
 0x12e   : > { %v739_v50 = vpop.f32.mrf.mxu1 }
 0x12f   : > { %v650_v51 = vpack.c.bf16 %v628_v49, %v627_v48  ;;  %v740_v53 = vadd.f32 %v1751_v37, %v739_v50 }
 0x131   : > { %778 = vmatmul.bf16.gmra.mxu1 %v650_v51  ;;  %v816_v56 = vmax.f32 %v740_v53, 0.0 }
 0x132   : > { %v579_v52 = vpop.f32.mrf.mxu0 }
 0x133   : > { %v580_v57 = vadd.f32 %v1689_v21, %v579_v52 }
 0x135   : > { %v629_v62 = vmax.f32 %v580_v57, 0.0 }
 0x136   : > { %v741_v54 = vpop.f32.mrf.mxu1 }
 0x137   : > { %v742_v55 = vadd.f32 %v1751_v37, %v741_v54 }
 0x139   : > { %v817_v58 = vmax.f32 %v742_v55, 0.0 }
 0x13a   : > { %v581_v59 = vpop.f32.mrf.mxu0 }
 0x13b   : > { %v582_v60 = vadd.f32 %v1689_v21, %v581_v59  ;;  %v847_v61 = vpack.c.bf16 %v817_v58, %v816_v56  ;;  %v1549_v59 = vld [vmem:[%s1974_s7 + $0x38] sm:$0xff] }
 0x13c   : > { %1135 = vmatpush.bf16.msra.mxu3 %v1549_v59 }
 0x13d   : > { %v630_v63 = vmax.f32 %v582_v60, 0.0  ;;  %943 = vmatmul.bf16.gmra.mxu2 %v847_v61  ;;  %v1548_v61 = vld [vmem:[%s1974_s7 + $0x30] sm:$0xff] }
 0x13e   : > { %v744_v0 = vpop.f32.mrf.mxu1 }
 0x13f   : > { %v651_v1 = vpack.c.bf16 %v630_v63, %v629_v62  ;;  %v745_v3 = vadd.f32 %v1751_v37, %v744_v0 }
 0x140   : > { %1136 = vmatpush.bf16.msra.mxu3 %v1548_v61 }
 0x141   : > { %783 = vmatmul.bf16.gmra.mxu1 %v651_v1  ;;  %v818_v6 = vmax.f32 %v745_v3, 0.0  ;;  %v1547_v1 = vld [vmem:[%s1974_s7 + $0x28] sm:$0xff] }
 0x142   : > { %v584_v2 = vpop.f32.mrf.mxu0 }
 0x143   : > { %v585_v7 = vadd.f32 %v1689_v21, %v584_v2 }
 0x144   : > { %1137 = vmatpush.bf16.msra.mxu3 %v1547_v1 }
 0x145   : > { %v631_v12 = vmax.f32 %v585_v7, 0.0 }
 0x146   : > { %v746_v4 = vpop.f32.mrf.mxu1 }
 0x147   : > { %v747_v5 = vadd.f32 %v1751_v37, %v746_v4 }
 0x149   : > { %v819_v8 = vmax.f32 %v747_v5, 0.0 }
 0x14a   : > { %v586_v9 = vpop.f32.mrf.mxu0 }
 0x14b   : > { %v587_v10 = vadd.f32 %v1689_v21, %v586_v9  ;;  %v848_v11 = vpack.c.bf16 %v819_v8, %v818_v6  ;;  %v1546_v6 = vld [vmem:[%s1974_s7 + $0x20] sm:$0xff] }
 0x14c   : > { %1138 = vmatpush.bf16.msra.mxu3 %v1546_v6 }
 0x14d   : > { %v632_v13 = vmax.f32 %v587_v10, 0.0  ;;  %948 = vmatmul.bf16.gmra.mxu2 %v848_v11 }
 0x14e   : > { %v749_v14 = vpop.f32.mrf.mxu1 }
 0x14f   : > { %v652_v15 = vpack.c.bf16 %v632_v13, %v631_v12  ;;  %v750_v17 = vadd.f32 %v1751_v37, %v749_v14  ;;  %v1545_v13 = vld [vmem:[%s1974_s7 + $0x18] sm:$0xff] }
 0x150   : > { %1139 = vmatpush.bf16.msra.mxu3 %v1545_v13 }
 0x151   : > { %788 = vmatmul.bf16.gmra.mxu1 %v652_v15  ;;  %v820_v20 = vmax.f32 %v750_v17, 0.0  ;;  %v1544_v15 = vld [vmem:[%s1974_s7 + $0x10] sm:$0xff]  ;;  %v1543_v17 = vld [vmem:[%s1974_s7 + $0x8] sm:$0xff] }
 0x152   : > { %v589_v16 = vpop.f32.mrf.mxu0 }
 0x153   : > { %v590_v22 = vadd.f32 %v1689_v21, %v589_v16 }
 0x154   : > { %1140 = vmatpush.bf16.msra.mxu3 %v1544_v15 }
 0x155   : > { %v633_v27 = vmax.f32 %v590_v22, 0.0  ;;  %v1542_v22 = vld [vmem:[%s1974_s7] sm:$0xff] }
 0x156   : > { %v751_v18 = vpop.f32.mrf.mxu1 }
 0x157   : > { %v752_v19 = vadd.f32 %v1751_v37, %v751_v18 }
 0x158   : > { %1141 = vmatpush.bf16.msra.mxu3 %v1543_v17 }
 0x159   : > { %v821_v23 = vmax.f32 %v752_v19, 0.0 }
 0x15a   : > { %v591_v24 = vpop.f32.mrf.mxu0 }
 0x15b   : > { %v592_v25 = vadd.f32 %v1689_v21, %v591_v24  ;;  %v849_v26 = vpack.c.bf16 %v821_v23, %v820_v20 }
 0x15c   : > { %1142 = vmatpush.bf16.msra.mxu3 %v1542_v22 }
 0x15d   : > { %v634_v28 = vmax.f32 %v592_v25, 0.0  ;;  %953 = vmatmul.bf16.gmra.mxu2 %v849_v26 }
 0x15e   : > { %v754_v29 = vpop.f32.mrf.mxu1 }
 0x15f   : > { %v653_v30 = vpack.c.bf16 %v634_v28, %v633_v27  ;;  %v755_v32 = vadd.f32 %v1751_v37, %v754_v29 }
 0x161   : > { %793 = vmatmul.bf16.gmra.mxu1 %v653_v30  ;;  %v822_v35 = vmax.f32 %v755_v32, 0.0 }
 0x162   : > { %v594_v31 = vpop.f32.mrf.mxu0 }
 0x163   : > { %v595_v36 = vadd.f32 %v1689_v21, %v594_v31 }
 0x165   : > { %v635_v42 = vmax.f32 %v595_v36, 0.0 }
 0x166   : > { %v756_v33 = vpop.f32.mrf.mxu1 }
 0x167   : > { %v757_v34 = vadd.f32 %v1751_v37, %v756_v33  ;;  %v1812_v33 = vld [vmem:[%s1973_s6] ss:$0 sm:$0xff] }
 0x169   : > { %v823_v38 = vmax.f32 %v757_v34, 0.0 }
 0x16a   : > { %v596_v39 = vpop.f32.mrf.mxu0 }
 0x16b   : > { %v597_v40 = vadd.f32 %v1689_v21, %v596_v39  ;;  %v850_v41 = vpack.c.bf16 %v823_v38, %v822_v35 }
 0x16d   : > { %v636_v43 = vmax.f32 %v597_v40, 0.0  ;;  %958 = vmatmul.bf16.gmra.mxu2 %v850_v41 }
 0x16e   : > { %v759_v44 = vpop.f32.mrf.mxu1 }
 0x16f   : > { %v654_v45 = vpack.c.bf16 %v636_v43, %v635_v42  ;;  %v760_v47 = vadd.f32 %v1751_v37, %v759_v44 }
 0x171   : > { %798 = vmatmul.bf16.gmra.mxu1 %v654_v45  ;;  %v824_v50 = vmax.f32 %v760_v47, 0.0 }
 0x172   : > { %v599_v46 = vpop.f32.mrf.mxu0 }
 0x173   : > { %v600_v51 = vadd.f32 %v1689_v21, %v599_v46 }
 0x175   : > { %v637_v56 = vmax.f32 %v600_v51, 0.0 }
 0x176   : > { %v761_v48 = vpop.f32.mrf.mxu1 }
 0x177   : > { %v762_v49 = vadd.f32 %v1751_v37, %v761_v48 }
 0x179   : > { %v825_v52 = vmax.f32 %v762_v49, 0.0 }
 0x17a   : > { %v601_v53 = vpop.f32.mrf.mxu0 }
 0x17b   : > { %v602_v54 = vadd.f32 %v1689_v21, %v601_v53  ;;  %v851_v55 = vpack.c.bf16 %v825_v52, %v824_v50 }
 0x17d   : > { %v638_v57 = vmax.f32 %v602_v54, 0.0  ;;  %963 = vmatmul.bf16.gmra.mxu2 %v851_v55 }
 0x17e   : > { %v764_v58 = vpop.f32.mrf.mxu1 }
 0x17f   : > { %v655_v60 = vpack.c.bf16 %v638_v57, %v637_v56  ;;  %v765_v63 = vadd.f32 %v1751_v37, %v764_v58 }
 0x181   : > { %803 = vmatmul.bf16.gmra.mxu1 %v655_v60  ;;  %v826_v3 = vmax.f32 %v765_v63, 0.0 }
 0x182   : > { %v604_v62 = vpop.f32.mrf.mxu0 }
 0x183   : > { %v605_v4 = vadd.f32 %v1689_v21, %v604_v62 }
 0x185   : > { %v639_v10 = vmax.f32 %v605_v4, 0.0 }
 0x186   : > { %v766_v0 = vpop.f32.mrf.mxu1 }
 0x187   : > { %v767_v2 = vadd.f32 %v1751_v37, %v766_v0 }
 0x189   : > { %v827_v5 = vmax.f32 %v767_v2, 0.0 }
 0x18a   : > { %v606_v7 = vpop.f32.mrf.mxu0 }
 0x18b   : > { %v607_v8 = vadd.f32 %v1689_v21, %v606_v7  ;;  %v852_v9 = vpack.c.bf16 %v827_v5, %v826_v3 }
 0x18d   : > { %v640_v11 = vmax.f32 %v607_v8, 0.0  ;;  %968 = vmatmul.bf16.gmra.mxu2 %v852_v9 }
 0x18e   : > { %v769_v12 = vpop.f32.mrf.mxu1 }
 0x18f   : > { %v656_v14 = vpack.c.bf16 %v640_v11, %v639_v10  ;;  %v770_v21 = vadd.f32 %v1751_v37, %v769_v12 }
 0x191   : > { %808 = vmatmul.bf16.gmra.mxu1 %v656_v14  ;;  %v828_v19 = vmax.f32 %v770_v21, 0.0 }
 0x196   : > { %v771_v16 = vpop.f32.mrf.mxu1 }
 0x197   : > { %v772_v18 = vadd.f32 %v1751_v37, %v771_v16 }
 0x199   : > { %v829_v20 = vmax.f32 %v772_v18, 0.0 }
 0x19b   : > { %v853_v23 = vpack.c.bf16 %v829_v20, %v828_v19 }
 0x19d   : > { %973 = vmatmul.bf16.gmra.mxu2 %v853_v23 }
 0x19e   : > { %v774_v24 = vpop.f32.mrf.mxu1 }
 0x19f   : > { %v775_v25 = vadd.f32 %v1751_v37, %v774_v24 }
 0x1a1   : > { %v830_v28 = vmax.f32 %v775_v25, 0.0 }
 0x1a6   : > { %v776_v26 = vpop.f32.mrf.mxu1 }
 0x1a7   : > { %v777_v27 = vadd.f32 %v1751_v37, %v776_v26 }
 0x1a9   : > { %v831_v29 = vmax.f32 %v777_v27, 0.0 }
 0x1ab   : > { %v854_v30 = vpack.c.bf16 %v831_v29, %v830_v28 }
 0x1ad   : > { %978 = vmatmul.bf16.gmra.mxu2 %v854_v30 }
 0x1ae   : > { %v779_v31 = vpop.f32.mrf.mxu1 }
 0x1af   : > { %v780_v34 = vadd.f32 %v1751_v37, %v779_v31 }
 0x1b0   : > { %v939_v32 = vpop.f32.mrf.mxu2 }
 0x1b1   : > { %v940_v36 = vadd.f32 %v1812_v33, %v939_v32  ;;  %v832_v40 = vmax.f32 %v780_v34, 0.0 }
 0x1b3   : > { %v1019_v43 = vmax.f32 %v940_v36, 0.0 }
 0x1b6   : > { %v781_v35 = vpop.f32.mrf.mxu1 }
 0x1b7   : > { %v782_v38 = vadd.f32 %v1751_v37, %v781_v35 }
 0x1b8   : > { %v941_v39 = vpop.f32.mrf.mxu2 }
 0x1b9   : > { %v833_v41 = vmax.f32 %v782_v38, 0.0  ;;  %v942_v42 = vadd.f32 %v1812_v33, %v941_v39 }
 0x1bb   : > { %v1020_v44 = vmax.f32 %v942_v42, 0.0  ;;  %v855_v45 = vpack.c.bf16 %v833_v41, %v832_v40 }
 0x1bd   : > { %983 = vmatmul.bf16.gmra.mxu2 %v855_v45  ;;  %v1051_v46 = vpack.c.bf16 %v1020_v44, %v1019_v43 }
 0x1be   : > { %v784_v47 = vpop.f32.mrf.mxu1 }
 0x1bf   : > { %1143 = vmatmul.bf16.vlgmr.msra.gmra.mxu3 %v1051_v46  ;;  %v785_v49 = vadd.f32 %v1751_v37, %v784_v47 }
 0x1c0   : > { %v944_v48 = vpop.f32.mrf.mxu2 }
 0x1c1   : > { %v945_v51 = vadd.f32 %v1812_v33, %v944_v48  ;;  %v834_v54 = vmax.f32 %v785_v49, 0.0 }
 0x1c3   : > { %v1021_v57 = vmax.f32 %v945_v51, 0.0 }
 0x1c6   : > { %v786_v50 = vpop.f32.mrf.mxu1 }
 0x1c7   : > { %v787_v52 = vadd.f32 %v1751_v37, %v786_v50 }
 0x1c8   : > { %v946_v53 = vpop.f32.mrf.mxu2 }
 0x1c9   : > { %v835_v55 = vmax.f32 %v787_v52, 0.0  ;;  %v947_v56 = vadd.f32 %v1812_v33, %v946_v53 }
 0x1cb   : > { %v1022_v58 = vmax.f32 %v947_v56, 0.0  ;;  %v856_v59 = vpack.c.bf16 %v835_v55, %v834_v54 }
 0x1cd   : > { %988 = vmatmul.bf16.gmra.mxu2 %v856_v59  ;;  %v1052_v60 = vpack.c.bf16 %v1022_v58, %v1021_v57 }
 0x1ce   : > { %v789_v61 = vpop.f32.mrf.mxu1 }
 0x1cf   : > { %1148 = vmatmul.bf16.gmra.mxu3 %v1052_v60  ;;  %v790_v63 = vadd.f32 %v1751_v37, %v789_v61 }
 0x1d0   : > { %v949_v62 = vpop.f32.mrf.mxu2 }
 0x1d1   : > { %v950_v1 = vadd.f32 %v1812_v33, %v949_v62  ;;  %v836_v4 = vmax.f32 %v790_v63, 0.0 }
 0x1d3   : > { %v1023_v7 = vmax.f32 %v950_v1, 0.0 }
 0x1d6   : > { %v791_v0 = vpop.f32.mrf.mxu1 }
 0x1d7   : > { %v792_v2 = vadd.f32 %v1751_v37, %v791_v0 }
 0x1d8   : > { %v951_v3 = vpop.f32.mrf.mxu2 }
 0x1d9   : > { %v837_v5 = vmax.f32 %v792_v2, 0.0  ;;  %v952_v6 = vadd.f32 %v1812_v33, %v951_v3 }
 0x1db   : > { %v1024_v8 = vmax.f32 %v952_v6, 0.0  ;;  %v857_v9 = vpack.c.bf16 %v837_v5, %v836_v4 }
 0x1dd   : > { %993 = vmatmul.bf16.gmra.mxu2 %v857_v9  ;;  %v1053_v10 = vpack.c.bf16 %v1024_v8, %v1023_v7 }
 0x1de   : > { %v794_v11 = vpop.f32.mrf.mxu1 }
 0x1df   : > { %1153 = vmatmul.bf16.gmra.mxu3 %v1053_v10  ;;  %v795_v13 = vadd.f32 %v1751_v37, %v794_v11 }
 0x1e0   : > { %v954_v12 = vpop.f32.mrf.mxu2 }
 0x1e1   : > { %v955_v15 = vadd.f32 %v1812_v33, %v954_v12  ;;  %v838_v17 = vmax.f32 %v795_v13, 0.0 }
 0x1e3   : > { %v1025_v20 = vmax.f32 %v955_v15, 0.0 }
 0x1e6   : > { %v796_v14 = vpop.f32.mrf.mxu1 }
 0x1e7   : > { %v797_v21 = vadd.f32 %v1751_v37, %v796_v14 }
 0x1e8   : > { %v956_v16 = vpop.f32.mrf.mxu2 }
 0x1e9   : > { %v839_v18 = vmax.f32 %v797_v21, 0.0  ;;  %v957_v19 = vadd.f32 %v1812_v33, %v956_v16 }
 0x1eb   : > { %v858_v22 = vpack.c.bf16 %v839_v18, %v838_v17  ;;  %v1026_v23 = vmax.f32 %v957_v19, 0.0  ;;  %v1847_v17 = vld [vmem:[#allocation2] ss:$0 sm:$0xff] }
 0x1ed   : > { %998 = vmatmul.bf16.gmra.mxu2 %v858_v22  ;;  %v1054_v24 = vpack.c.bf16 %v1026_v23, %v1025_v20 }
 0x1ee   : > { %v799_v25 = vpop.f32.mrf.mxu1 }
 0x1ef   : > { %1158 = vmatmul.bf16.gmra.mxu3 %v1054_v24  ;;  %v800_v27 = vadd.f32 %v1751_v37, %v799_v25 }
 0x1f0   : > { %v959_v26 = vpop.f32.mrf.mxu2 }
 0x1f1   : > { %v960_v29 = vadd.f32 %v1812_v33, %v959_v26  ;;  %v840_v32 = vmax.f32 %v800_v27, 0.0 }
 0x1f3   : > { %v1027_v36 = vmax.f32 %v960_v29, 0.0 }
 0x1f6   : > { %v801_v28 = vpop.f32.mrf.mxu1 }
 0x1f7   : > { %v802_v30 = vadd.f32 %v1751_v37, %v801_v28 }
 0x1f8   : > { %v961_v31 = vpop.f32.mrf.mxu2 }
 0x1f9   : > { %v841_v34 = vmax.f32 %v802_v30, 0.0  ;;  %v962_v35 = vadd.f32 %v1812_v33, %v961_v31 }
 0x1fb   : > { %v859_v38 = vpack.c.bf16 %v841_v34, %v840_v32  ;;  %v1028_v39 = vmax.f32 %v962_v35, 0.0 }
 0x1fd   : > { %1003 = vmatmul.bf16.gmra.mxu2 %v859_v38  ;;  %v1055_v40 = vpack.c.bf16 %v1028_v39, %v1027_v36 }
 0x1fe   : > { %v804_v41 = vpop.f32.mrf.mxu1 }
 0x1ff   : > { %1163 = vmatmul.bf16.gmra.mxu3 %v1055_v40  ;;  %v805_v43 = vadd.f32 %v1751_v37, %v804_v41 }
 0x200   : > { %v964_v42 = vpop.f32.mrf.mxu2 }
 0x201   : > { %v965_v45 = vadd.f32 %v1812_v33, %v964_v42  ;;  %v842_v48 = vmax.f32 %v805_v43, 0.0 }
 0x203   : > { %v1029_v51 = vmax.f32 %v965_v45, 0.0 }
 0x206   : > { %v806_v44 = vpop.f32.mrf.mxu1 }
 0x207   : > { %v807_v46 = vadd.f32 %v1751_v37, %v806_v44 }
 0x208   : > { %v966_v47 = vpop.f32.mrf.mxu2 }
 0x209   : > { %v843_v49 = vmax.f32 %v807_v46, 0.0  ;;  %v967_v50 = vadd.f32 %v1812_v33, %v966_v47 }
 0x20b   : > { %v860_v52 = vpack.c.bf16 %v843_v49, %v842_v48  ;;  %v1030_v53 = vmax.f32 %v967_v50, 0.0 }
 0x20d   : > { %1008 = vmatmul.bf16.gmra.mxu2 %v860_v52  ;;  %v1056_v54 = vpack.c.bf16 %v1030_v53, %v1029_v51 }
 0x20e   : > { %v809_v55 = vpop.f32.mrf.mxu1 }
 0x20f   : > { %1168 = vmatmul.bf16.gmra.mxu3 %v1056_v54  ;;  %v810_v57 = vadd.f32 %v1751_v37, %v809_v55 }
 0x210   : > { %v969_v56 = vpop.f32.mrf.mxu2 }
 0x211   : > { %v970_v59 = vadd.f32 %v1812_v33, %v969_v56  ;;  %v844_v62 = vmax.f32 %v810_v57, 0.0 }
 0x213   : > { %v1031_v1 = vmax.f32 %v970_v59, 0.0 }
 0x216   : > { %v811_v58 = vpop.f32.mrf.mxu1 }
 0x217   : > { %v812_v60 = vadd.f32 %v1751_v37, %v811_v58 }
 0x218   : > { %v971_v61 = vpop.f32.mrf.mxu2 }
 0x219   : > { %v845_v63 = vmax.f32 %v812_v60, 0.0  ;;  %v972_v0 = vadd.f32 %v1812_v33, %v971_v61 }
 0x21b   : > { %v861_v2 = vpack.c.bf16 %v845_v63, %v844_v62  ;;  %v1032_v3 = vmax.f32 %v972_v0, 0.0 }
 0x21d   : > { %1013 = vmatmul.bf16.gmra.mxu2 %v861_v2  ;;  %v1057_v4 = vpack.c.bf16 %v1032_v3, %v1031_v1 }
 0x21f   : > { %1173 = vmatmul.bf16.gmra.mxu3 %v1057_v4 }
 0x220   : > { %v974_v5 = vpop.f32.mrf.mxu2 }
 0x221   : > { %v975_v6 = vadd.f32 %v1812_v33, %v974_v5 }
 0x223   : > { %v1033_v9 = vmax.f32 %v975_v6, 0.0 }
 0x228   : > { %v976_v7 = vpop.f32.mrf.mxu2 }
 0x229   : > { %v977_v8 = vadd.f32 %v1812_v33, %v976_v7 }
 0x22b   : > { %v1034_v37 = vmax.f32 %v977_v8, 0.0 }
 0x22d   : > { %v1058_v10 = vpack.c.bf16 %v1034_v37, %v1033_v9 }
 0x22f   : > { %1178 = vmatmul.bf16.gmra.mxu3 %v1058_v10 }
 0x230   : > { %v979_v11 = vpop.f32.mrf.mxu2 }
 0x231   : > { %v980_v12 = vadd.f32 %v1812_v33, %v979_v11 }
 0x233   : > { %v1035_v15 = vmax.f32 %v980_v12, 0.0 }
 0x238   : > { %v981_v13 = vpop.f32.mrf.mxu2 }
 0x239   : > { %v982_v14 = vadd.f32 %v1812_v33, %v981_v13 }
 0x23b   : > { %v1036_v21 = vmax.f32 %v982_v14, 0.0 }
 0x23d   : > { %v1059_v16 = vpack.c.bf16 %v1036_v21, %v1035_v15 }
 0x23f   : > { %1183 = vmatmul.bf16.gmra.mxu3 %v1059_v16 }
 0x240   : > { %v984_v18 = vpop.f32.mrf.mxu2 }
 0x241   : > { %v985_v22 = vadd.f32 %v1812_v33, %v984_v18 }
 0x242   : > { %v1144_v19 = vpop.f32.mrf.mxu3 }
 0x243   : > { %v1145_v20 = vadd.f32 %v1847_v17, %v1144_v19  ;;  %v1037_v26 = vmax.f32 %v985_v22, 0.0 }
 0x245   : > { %1225 = vst.msk [vmem:[%s1852_s18] sm:$0xff] %vm1224_vm1, %v1145_v20 }
 0x248   : > { %v986_v23 = vpop.f32.mrf.mxu2 }
 0x249   : > { %v987_v24 = vadd.f32 %v1812_v33, %v986_v23 }
 0x24a   : > { %v1146_v25 = vpop.f32.mrf.mxu3 }
 0x24b   : > { %v1038_v27 = vmax.f32 %v987_v24, 0.0  ;;  %v1147_v28 = vadd.f32 %v1847_v17, %v1146_v25 }
 0x24d   : > { %1226 = vst.msk [vmem:[%s1852_s18 + $0x8] sm:$0xff] %vm1224_vm1, %v1147_v28  ;;  %v1060_v29 = vpack.c.bf16 %v1038_v27, %v1037_v26 }
 0x24f   : > { %1188 = vmatmul.bf16.gmra.mxu3 %v1060_v29 }
 0x250   : > { %v989_v30 = vpop.f32.mrf.mxu2 }
 0x251   : > { %v990_v34 = vadd.f32 %v1812_v33, %v989_v30 }
 0x252   : > { %v1149_v31 = vpop.f32.mrf.mxu3 }
 0x253   : > { %v1150_v32 = vadd.f32 %v1847_v17, %v1149_v31  ;;  %v1039_v39 = vmax.f32 %v990_v34, 0.0 }
 0x255   : > { %1227 = vst.msk [vmem:[%s1852_s18 + $0x10] sm:$0xff] %vm1224_vm1, %v1150_v32 }
 0x258   : > { %v991_v35 = vpop.f32.mrf.mxu2 }
 0x259   : > { %v992_v36 = vadd.f32 %v1812_v33, %v991_v35 }
 0x25a   : > { %v1151_v38 = vpop.f32.mrf.mxu3 }
 0x25b   : > { %v1040_v40 = vmax.f32 %v992_v36, 0.0  ;;  %v1152_v41 = vadd.f32 %v1847_v17, %v1151_v38 }
 0x25d   : > { %1228 = vst.msk [vmem:[%s1852_s18 + $0x18] sm:$0xff] %vm1224_vm1, %v1152_v41  ;;  %v1061_v42 = vpack.c.bf16 %v1040_v40, %v1039_v39 }
 0x25f   : > { %1193 = vmatmul.bf16.gmra.mxu3 %v1061_v42 }
 0x260   : > { %v994_v43 = vpop.f32.mrf.mxu2 }
 0x261   : > { %v995_v46 = vadd.f32 %v1812_v33, %v994_v43 }
 0x262   : > { %v1154_v44 = vpop.f32.mrf.mxu3 }
 0x263   : > { %v1155_v45 = vadd.f32 %v1847_v17, %v1154_v44  ;;  %v1041_v50 = vmax.f32 %v995_v46, 0.0 }
 0x265   : > { %1229 = vst.msk [vmem:[%s1852_s18 + $0x20] sm:$0xff] %vm1224_vm1, %v1155_v45 }
 0x268   : > { %v996_v47 = vpop.f32.mrf.mxu2 }
 0x269   : > { %v997_v48 = vadd.f32 %v1812_v33, %v996_v47 }
 0x26a   : > { %v1156_v49 = vpop.f32.mrf.mxu3 }
 0x26b   : > { %v1042_v51 = vmax.f32 %v997_v48, 0.0  ;;  %v1157_v52 = vadd.f32 %v1847_v17, %v1156_v49 }
 0x26d   : > { %1230 = vst.msk [vmem:[%s1852_s18 + $0x28] sm:$0xff] %vm1224_vm1, %v1157_v52  ;;  %v1062_v53 = vpack.c.bf16 %v1042_v51, %v1041_v50 }
 0x26f   : > { %1198 = vmatmul.bf16.gmra.mxu3 %v1062_v53 }
 0x270   : > { %v999_v54 = vpop.f32.mrf.mxu2 }
 0x271   : > { %v1000_v57 = vadd.f32 %v1812_v33, %v999_v54 }
 0x272   : > { %v1159_v55 = vpop.f32.mrf.mxu3 }
 0x273   : > { %v1160_v56 = vadd.f32 %v1847_v17, %v1159_v55  ;;  %v1043_v61 = vmax.f32 %v1000_v57, 0.0 }
 0x275   : > { %1231 = vst.msk [vmem:[%s1852_s18 + $0x30] sm:$0xff] %vm1224_vm1, %v1160_v56 }
 0x278   : > { %v1001_v58 = vpop.f32.mrf.mxu2 }
 0x279   : > { %v1002_v59 = vadd.f32 %v1812_v33, %v1001_v58 }
 0x27a   : > { %v1161_v60 = vpop.f32.mrf.mxu3 }
 0x27b   : > { %v1044_v62 = vmax.f32 %v1002_v59, 0.0  ;;  %v1162_v63 = vadd.f32 %v1847_v17, %v1161_v60 }
 0x27d   : > { %v1063_v0 = vpack.c.bf16 %v1044_v62, %v1043_v61  ;;  %1232 = vst.msk [vmem:[%s1852_s18 + $0x38] sm:$0xff] %vm1224_vm1, %v1162_v63 }
 0x27f   : > { %1203 = vmatmul.bf16.gmra.mxu3 %v1063_v0 }
 0x280   : > { %v1004_v1 = vpop.f32.mrf.mxu2 }
 0x281   : > { %v1005_v4 = vadd.f32 %v1812_v33, %v1004_v1 }
 0x282   : > { %v1164_v2 = vpop.f32.mrf.mxu3 }
 0x283   : > { %v1165_v3 = vadd.f32 %v1847_v17, %v1164_v2  ;;  %v1045_v8 = vmax.f32 %v1005_v4, 0.0 }
 0x285   : > { %1233 = vst.msk [vmem:[%s1852_s18 + $0x40] sm:$0xff] %vm1224_vm1, %v1165_v3 }
 0x288   : > { %v1006_v5 = vpop.f32.mrf.mxu2 }
 0x289   : > { %v1007_v6 = vadd.f32 %v1812_v33, %v1006_v5 }
 0x28a   : > { %v1166_v7 = vpop.f32.mrf.mxu3 }
 0x28b   : > { %v1046_v9 = vmax.f32 %v1007_v6, 0.0  ;;  %v1167_v37 = vadd.f32 %v1847_v17, %v1166_v7 }
 0x28d   : > { %v1064_v10 = vpack.c.bf16 %v1046_v9, %v1045_v8  ;;  %1234 = vst.msk [vmem:[%s1852_s18 + $0x48] sm:$0xff] %vm1224_vm1, %v1167_v37 }
 0x28f   : > { %1208 = vmatmul.bf16.gmra.mxu3 %v1064_v10 }
 0x290   : > { %v1009_v11 = vpop.f32.mrf.mxu2 }
 0x291   : > { %v1010_v14 = vadd.f32 %v1812_v33, %v1009_v11 }
 0x292   : > { %v1169_v12 = vpop.f32.mrf.mxu3 }
 0x293   : > { %v1170_v13 = vadd.f32 %v1847_v17, %v1169_v12  ;;  %v1047_v18 = vmax.f32 %v1010_v14, 0.0 }
 0x295   : > { %1235 = vst.msk [vmem:[%s1852_s18 + $0x50] sm:$0xff] %vm1224_vm1, %v1170_v13 }
 0x298   : > { %v1011_v15 = vpop.f32.mrf.mxu2 }
 0x299   : > { %v1012_v21 = vadd.f32 %v1812_v33, %v1011_v15 }
 0x29a   : > { %v1171_v16 = vpop.f32.mrf.mxu3 }
 0x29b   : > { %v1048_v19 = vmax.f32 %v1012_v21, 0.0  ;;  %v1172_v20 = vadd.f32 %v1847_v17, %v1171_v16 }
 0x29d   : > { %v1065_v22 = vpack.c.bf16 %v1048_v19, %v1047_v18  ;;  %1236 = vst.msk [vmem:[%s1852_s18 + $0x58] sm:$0xff] %vm1224_vm1, %v1172_v20 }
 0x29f   : > { %1213 = vmatmul.bf16.gmra.mxu3 %v1065_v22 }
 0x2a0   : > { %v1014_v23 = vpop.f32.mrf.mxu2 }
 0x2a1   : > { %v1015_v26 = vadd.f32 %v1812_v33, %v1014_v23 }
 0x2a2   : > { %v1174_v24 = vpop.f32.mrf.mxu3 }
 0x2a3   : > { %v1175_v25 = vadd.f32 %v1847_v17, %v1174_v24  ;;  %v1049_v30 = vmax.f32 %v1015_v26, 0.0 }
 0x2a5   : > { %1237 = vst.msk [vmem:[%s1852_s18 + $0x60] sm:$0xff] %vm1224_vm1, %v1175_v25 }
 0x2a8   : > { %v1016_v27 = vpop.f32.mrf.mxu2 }
 0x2a9   : > { %v1017_v28 = vadd.f32 %v1812_v33, %v1016_v27 }
 0x2aa   : > { %v1176_v29 = vpop.f32.mrf.mxu3 }
 0x2ab   : > { %v1050_v31 = vmax.f32 %v1017_v28, 0.0  ;;  %v1177_v32 = vadd.f32 %v1847_v17, %v1176_v29 }
 0x2ad   : > { %v1066_v34 = vpack.c.bf16 %v1050_v31, %v1049_v30  ;;  %1238 = vst.msk [vmem:[%s1852_s18 + $0x68] sm:$0xff] %vm1224_vm1, %v1177_v32 }
 0x2af   : > { %1218 = vmatmul.bf16.gmra.mxu3 %v1066_v34 }
 0x2b2   : > { %v1179_v35 = vpop.f32.mrf.mxu3 }
 0x2b3   : > { %v1180_v36 = vadd.f32 %v1847_v17, %v1179_v35 }
 0x2b5   : > { %1239 = vst.msk [vmem:[%s1852_s18 + $0x70] sm:$0xff] %vm1224_vm1, %v1180_v36 }
 0x2ba   : > { %v1181_v38 = vpop.f32.mrf.mxu3 }
 0x2bb   : > { %v1182_v33 = vadd.f32 %v1847_v17, %v1181_v38 }
 0x2bd   : > { %1240 = vst.msk [vmem:[%s1852_s18 + $0x78] sm:$0xff] %vm1224_vm1, %v1182_v33 }
 0x2c2   : > { %v1184_v39 = vpop.f32.mrf.mxu3 }
 0x2c3   : > { %v1185_v40 = vadd.f32 %v1847_v17, %v1184_v39 }
 0x2c5   : > { %1241 = vst.msk [vmem:[%s1852_s18 + $0x80] sm:$0xff] %vm1224_vm1, %v1185_v40 }
 0x2ca   : > { %v1186_v41 = vpop.f32.mrf.mxu3 }
 0x2cb   : > { %v1187_v42 = vadd.f32 %v1847_v17, %v1186_v41 }
 0x2cd   : > { %1242 = vst.msk [vmem:[%s1852_s18 + $0x88] sm:$0xff] %vm1224_vm1, %v1187_v42 }
 0x2d2   : > { %v1189_v43 = vpop.f32.mrf.mxu3 }
 0x2d3   : > { %v1190_v44 = vadd.f32 %v1847_v17, %v1189_v43 }
 0x2d5   : > { %1243 = vst.msk [vmem:[%s1852_s18 + $0x90] sm:$0xff] %vm1224_vm1, %v1190_v44 }
 0x2da   : > { %v1191_v45 = vpop.f32.mrf.mxu3 }
 0x2db   : > { %v1192_v46 = vadd.f32 %v1847_v17, %v1191_v45 }
 0x2dd   : > { %1244 = vst.msk [vmem:[%s1852_s18 + $0x98] sm:$0xff] %vm1224_vm1, %v1192_v46 }
 0x2e2   : > { %v1194_v47 = vpop.f32.mrf.mxu3 }
 0x2e3   : > { %v1195_v48 = vadd.f32 %v1847_v17, %v1194_v47 }
 0x2e5   : > { %1245 = vst.msk [vmem:[%s1852_s18 + $0xa0] sm:$0xff] %vm1224_vm1, %v1195_v48 }
 0x2ea   : > { %v1196_v49 = vpop.f32.mrf.mxu3 }
 0x2eb   : > { %v1197_v50 = vadd.f32 %v1847_v17, %v1196_v49 }
 0x2ed   : > { %1246 = vst.msk [vmem:[%s1852_s18 + $0xa8] sm:$0xff] %vm1224_vm1, %v1197_v50 }
 0x2f2   : > { %v1199_v51 = vpop.f32.mrf.mxu3 }
 0x2f3   : > { %v1200_v52 = vadd.f32 %v1847_v17, %v1199_v51 }
 0x2f5   : > { %1247 = vst.msk [vmem:[%s1852_s18 + $0xb0] sm:$0xff] %vm1224_vm1, %v1200_v52 }
 0x2fa   : > { %v1201_v53 = vpop.f32.mrf.mxu3 }
 0x2fb   : > { %v1202_v54 = vadd.f32 %v1847_v17, %v1201_v53 }
 0x2fd   : > { %1248 = vst.msk [vmem:[%s1852_s18 + $0xb8] sm:$0xff] %vm1224_vm1, %v1202_v54 }
 0x302   : > { %v1204_v55 = vpop.f32.mrf.mxu3 }
 0x303   : > { %v1205_v56 = vadd.f32 %v1847_v17, %v1204_v55 }
 0x305   : > { %1249 = vst.msk [vmem:[%s1852_s18 + $0xc0] sm:$0xff] %vm1224_vm1, %v1205_v56 }
 0x30a   : > { %v1206_v57 = vpop.f32.mrf.mxu3 }
 0x30b   : > { %v1207_v58 = vadd.f32 %v1847_v17, %v1206_v57 }
 0x30d   : > { %1250 = vst.msk [vmem:[%s1852_s18 + $0xc8] sm:$0xff] %vm1224_vm1, %v1207_v58 }
 0x312   : > { %v1209_v59 = vpop.f32.mrf.mxu3 }
 0x313   : > { %v1210_v60 = vadd.f32 %v1847_v17, %v1209_v59 }
 0x315   : > { %1251 = vst.msk [vmem:[%s1852_s18 + $0xd0] sm:$0xff] %vm1224_vm1, %v1210_v60 }
 0x31a   : > { %v1211_v61 = vpop.f32.mrf.mxu3 }
 0x31b   : > { %v1212_v62 = vadd.f32 %v1847_v17, %v1211_v61 }
 0x31d   : > { %1252 = vst.msk [vmem:[%s1852_s18 + $0xd8] sm:$0xff] %vm1224_vm1, %v1212_v62 }
 0x322   : > { %v1214_v63 = vpop.f32.mrf.mxu3 }
 0x323   : > { %v1215_v0 = vadd.f32 %v1847_v17, %v1214_v63 }
 0x325   : > { %1253 = vst.msk [vmem:[%s1852_s18 + $0xe0] sm:$0xff] %vm1224_vm1, %v1215_v0 }
 0x32a   : > { %v1216_v1 = vpop.f32.mrf.mxu3 }
 0x32b   : > { %v1217_v2 = vadd.f32 %v1847_v17, %v1216_v1 }
 0x32d   : > { %1254 = vst.msk [vmem:[%s1852_s18 + $0xe8] sm:$0xff] %vm1224_vm1, %v1217_v2 }
 0x332   : > { %v1219_v3 = vpop.f32.mrf.mxu3 }
 0x333   : > { %v1220_v4 = vadd.f32 %v1847_v17, %v1219_v3 }
 0x335   : > { %1255 = vst.msk [vmem:[%s1852_s18 + $0xf0] sm:$0xff] %vm1224_vm1, %v1220_v4 }
 0x33a   : > { %v1221_v5 = vpop.f32.mrf.mxu3 }
 0x33b   : > { %v1222_v6 = vadd.f32 %v1847_v17, %v1221_v5 }
 0x33d   : > { %1256 = vst.msk [vmem:[%s1852_s18 + $0xf8] sm:$0xff] %vm1224_vm1, %v1222_v6 }
 0x33e PF: > { %s21_s11 = sadd.s32 1, %s1568_s11  }
 0x33f   : > { %p18_p4 = scmp.ge.s32.totalorder %s21_s11, 6  }
 0x341   :  { %20 = sbr.rel (!%p18_p4) target bundleno = 3 (0x3), region = 86 }

// kernel: tpu_custom_call.1
= control target key start
LH: loop header
LB: loop body
LE: loop exit
PB: predicated region body
PF: predicated region fallthrough
CT: control target
= control target key end

     0   :  { %s1623_s11 = smov 0   ;;  %s1967_s0 = inlined_call_operand.vmem [shape: bf16[1024,32], index: 0, kind: input, shape index: {}]   ;;  %s1968_s1 = inlined_call_operand.vmem [shape: bf16[32,128], index: 1, kind: input, shape index: {}]   ;;  %s1969_s2 = inlined_call_operand.vmem [shape: f32[1,128], index: 2, kind: input, shape index: {}]   ;;  %s1970_s3 = inlined_call_operand.vmem [shape: bf16[128,128], index: 3, kind: input, shape index: {}]   ;;  %s1971_s4 = inlined_call_operand.vmem [shape: f32[1,128], index: 4, kind: input, shape index: {}]   ;;  %s1972_s5 = inlined_call_operand.vmem [shape: bf16[128,128], index: 5, kind: input, shape index: {}]   ;;  %s1973_s6 = inlined_call_operand.vmem [shape: f32[1,128], index: 6, kind: input, shape index: {}]   ;;  %s1974_s7 = inlined_call_operand.vmem [shape: bf16[128,1], index: 7, kind: input, shape index: {}]   ;;  %s1975_s8 = inlined_call_operand.<no memory space> [shape: f32[1,1], index: 8, kind: input, shape index: {}]   ;;  %s1976_s9 = inlined_call_operand.vmem [shape: f32[1024,1], index: 9, kind: output, shape index: {}]  }
   0x1   :  { %v14_v0 = vstv %s1975_s8 }
   0x2   :  { %15 = vst [vmem:[#allocation2] sm:$0x1] %v14_v0 }
   0x3 LB: > { %s1313_s12 = sadd.s32 4294967295, %s1568_s11   ;;  %p1317_p0 = scmp.ge.s32.totalorder %s1568_s11, 1  ;;  %s1568_s11 = sphi %s1623_s11, %s21_s11  }
   0x4   : > { %p290_p1 = scmp.lt.s32.totalorder %s1568_s11, 5 }
   0x6   : > { %p291_p2 = pnand %p1317_p0, %p290_p1 }
   0x7   : > { %s1318_s8 = sshll.u32 (!%p291_p2), %s1313_s12, 5 }
   0x8   : > { %294 = sbr.rel (%p291_p2) target bundleno = 830 (0x33e), region = 56  ;;  %p327_p3 = scmp.lt.s32.totalorder (!%p291_p2), %s1318_s8, 127 }
   0xd   : > { %v1525_v1 = vld [vmem:[%s1968_s1 + $0x8] sm:$0xff]  ;;  %v1524_v2 = vld [vmem:[%s1968_s1] sm:$0xff]  ;;  %s1978_s8 = smov (!%p327_p3, %s1318_s8), 127  ;;  %vm471_vm0 = vcmask 261120   ;;  %v1533_v8 = vld [vmem:[%s1970_s3 + $0x38] sm:$0xff]  ;;  %vm1224_vm1 = vcmask 7168  }
   0xe   : > { %526 = vmatpush.bf16.msra.mxu0 %v1525_v1  ;;  %s1319_s17 = sshll.u32 %s1978_s8, 2  ;;  %725 = vmatpush.bf16.msra.mxu1 %v1533_v8  ;;  %v1532_v10 = vld [vmem:[%s1970_s3 + $0x30] sm:$0xff]  ;;  %v1531_v11 = vld [vmem:[%s1970_s3 + $0x28] sm:$0xff]  ;;  %v1530_v12 = vld [vmem:[%s1970_s3 + $0x20] sm:$0xff] }
   0xf   : > { %s1643_s20 = scalar_lea.vmem %s1967_s0, %s1319_s17  ;;  %v1529_v13 = vld [vmem:[%s1970_s3 + $0x18] sm:$0xff]  ;;  %v1528_v15 = vld [vmem:[%s1970_s3 + $0x10] sm:$0xff]  ;;  %v1527_v16 = vld [vmem:[%s1970_s3 + $0x8] sm:$0xff] }
  0x10   : > { %v1508_v3 = vld [vmem:[%s1643_s20] sm:$0xff]  ;;  %v1509_v4 = vld [vmem:[%s1643_s20 + $0x8] sm:$0xff]  ;;  %v1510_v5 = vld [vmem:[%s1643_s20 + $0x10] sm:$0xff] }
  0x11   : > { %v1511_v6 = vld [vmem:[%s1643_s20 + $0x18] sm:$0xff]  ;;  %v1512_v7 = vld [vmem:[%s1643_s20 + $0x20] sm:$0xff]  ;;  %v1513_v9 = vld [vmem:[%s1643_s20 + $0x28] sm:$0xff] }
  0x12   : > { %527 = vmatpush.bf16.msra.mxu0 %v1524_v2  ;;  %726 = vmatpush.bf16.msra.mxu1 %v1532_v10  ;;  %v1514_v14 = vld [vmem:[%s1643_s20 + $0x30] sm:$0xff]  ;;  %v1526_v17 = vld [vmem:[%s1970_s3] sm:$0xff]  ;;  %v1515_v18 = vld [vmem:[%s1643_s20 + $0x38] sm:$0xff] }
  0x13   : > { %v1516_v19 = vld [vmem:[%s1643_s20 + $0x40] sm:$0xff]  ;;  %v1517_v28 = vld [vmem:[%s1643_s20 + $0x48] sm:$0xff]  ;;  %v1518_v36 = vld [vmem:[%s1643_s20 + $0x50] sm:$0xff] }
  0x14   : > { %v1689_v21 = vld [vmem:[%s1969_s2] ss:$0 sm:$0xff]  ;;  %v1519_v44 = vld [vmem:[%s1643_s20 + $0x58] sm:$0xff]  ;;  %v1521_v60 = vld [vmem:[%s1643_s20 + $0x68] sm:$0xff] }
  0x15   : > { %1394 = vmatmul.msk.bf16.vlgmr.msra.gmra.mxu0 %vm471_vm0, %v1508_v3  ;;  %v1520_v52 = vld [vmem:[%s1643_s20 + $0x60] sm:$0xff]  ;;  %v1541_v1 = vld [vmem:[%s1972_s5 + $0x38] sm:$0xff]  ;;  %v1539_v8 = vld [vmem:[%s1972_s5 + $0x28] sm:$0xff] }
  0x16   : > { %727 = vmatpush.bf16.msra.mxu1 %v1531_v11  ;;  %930 = vmatpush.bf16.msra.mxu2 %v1541_v1 }
  0x1a   : > { %728 = vmatpush.bf16.msra.mxu1 %v1530_v12 }
  0x1e   : > { %729 = vmatpush.bf16.msra.mxu1 %v1529_v13  ;;  %v1537_v13 = vld [vmem:[%s1972_s5 + $0x18] sm:$0xff] }
  0x22   : > { %730 = vmatpush.bf16.msra.mxu1 %v1528_v15 }
  0x25   : > { %1395 = vmatmul.msk.bf16.gmra.mxu0 %vm471_vm0, %v1509_v4 }
  0x26   : > { %731 = vmatpush.bf16.msra.mxu1 %v1527_v16 }
  0x2a   : > { %732 = vmatpush.bf16.msra.mxu1 %v1526_v17  ;;  %v1536_v17 = vld [vmem:[%s1972_s5 + $0x10] sm:$0xff] }
  0x35   : > { %1396 = vmatmul.msk.bf16.gmra.mxu0 %vm471_vm0, %v1510_v5  ;;  %v1540_v5 = vld [vmem:[%s1972_s5 + $0x30] sm:$0xff] }
  0x36   : > { %931 = vmatpush.bf16.msra.mxu2 %v1540_v5 }
  0x3a   : > { %932 = vmatpush.bf16.msra.mxu2 %v1539_v8 }
  0x45   : > { %1397 = vmatmul.msk.bf16.gmra.mxu0 %vm471_vm0, %v1511_v6  ;;  %v1522_v6 = vld [vmem:[%s1643_s20 + $0x70] sm:$0xff] }
  0x55   : > { %1398 = vmatmul.msk.bf16.gmra.mxu0 %vm471_vm0, %v1512_v7 }
  0x65   : > { %1399 = vmatmul.msk.bf16.gmra.mxu0 %vm471_vm0, %v1513_v9  ;;  %v1538_v9 = vld [vmem:[%s1972_s5 + $0x20] sm:$0xff] }
  0x66   : > { %933 = vmatpush.bf16.msra.mxu2 %v1538_v9 }
  0x6a   : > { %934 = vmatpush.bf16.msra.mxu2 %v1537_v13 }
  0x6e   : > { %935 = vmatpush.bf16.msra.mxu2 %v1536_v17 }
  0x75   : > { %1400 = vmatmul.msk.bf16.gmra.mxu0 %vm471_vm0, %v1514_v14 }
  0x85   : > { %1401 = vmatmul.msk.bf16.gmra.mxu0 %vm471_vm0, %v1515_v18  ;;  %v1523_v18 = vld [vmem:[%s1643_s20 + $0x78] sm:$0xff]  ;;  %s1321_s20 = sshll.u32 %s1978_s8, 3 }
  0x86   : > { %s1852_s18 = scalar_lea.vmem %s1976_s9, %s1321_s20 }
  0x92   : > { %v529_v20 = vpop.f32.mrf.mxu0 }
  0x93   : > { %v530_v22 = vadd.f32 %v1689_v21, %v529_v20  ;;  %v1535_v20 = vld [vmem:[%s1972_s5 + $0x8] sm:$0xff] }
  0x94   : > { %936 = vmatpush.bf16.msra.mxu2 %v1535_v20 }
  0x95   : > { %1402 = vmatmul.msk.bf16.gmra.mxu0 %vm471_vm0, %v1516_v19  ;;  %v609_v25 = vmax.f32 %v530_v22, 0.0  ;;  %v1534_v22 = vld [vmem:[%s1972_s5] sm:$0xff] }
  0x98   : > { %937 = vmatpush.bf16.msra.mxu2 %v1534_v22 }
  0x9a   : > { %v531_v23 = vpop.f32.mrf.mxu0 }
  0x9b   : > { %v532_v24 = vadd.f32 %v1689_v21, %v531_v23 }
  0x9d   : > { %v610_v26 = vmax.f32 %v532_v24, 0.0 }
  0x9f   : > { %v641_v27 = vpack.c.bf16 %v610_v26, %v609_v25 }
  0xa1   : > { %733 = vmatmul.bf16.vlgmr.msra.gmra.mxu1 %v641_v27 }
  0xa2   : > { %v534_v29 = vpop.f32.mrf.mxu0 }
  0xa3   : > { %v535_v30 = vadd.f32 %v1689_v21, %v534_v29 }
  0xa5   : > { %1403 = vmatmul.msk.bf16.gmra.mxu0 %vm471_vm0, %v1517_v28  ;;  %v611_v33 = vmax.f32 %v535_v30, 0.0 }
  0xaa   : > { %v536_v31 = vpop.f32.mrf.mxu0 }
  0xab   : > { %v537_v32 = vadd.f32 %v1689_v21, %v536_v31 }
  0xad   : > { %v612_v34 = vmax.f32 %v537_v32, 0.0 }
  0xaf   : > { %v642_v35 = vpack.c.bf16 %v612_v34, %v611_v33 }
  0xb1   : > { %738 = vmatmul.bf16.gmra.mxu1 %v642_v35 }
  0xb2   : > { %v539_v37 = vpop.f32.mrf.mxu0 }
  0xb3   : > { %v540_v38 = vadd.f32 %v1689_v21, %v539_v37  ;;  %v1751_v37 = vld [vmem:[%s1971_s4] ss:$0 sm:$0xff] }
  0xb5   : > { %1404 = vmatmul.msk.bf16.gmra.mxu0 %vm471_vm0, %v1518_v36  ;;  %v613_v41 = vmax.f32 %v540_v38, 0.0 }
  0xba   : > { %v541_v39 = vpop.f32.mrf.mxu0 }
  0xbb   : > { %v542_v40 = vadd.f32 %v1689_v21, %v541_v39 }
  0xbd   : > { %v614_v42 = vmax.f32 %v542_v40, 0.0 }
  0xbf   : > { %v643_v43 = vpack.c.bf16 %v614_v42, %v613_v41 }
  0xc1   : > { %743 = vmatmul.bf16.gmra.mxu1 %v643_v43 }
  0xc2   : > { %v544_v45 = vpop.f32.mrf.mxu0 }
  0xc3   : > { %v545_v46 = vadd.f32 %v1689_v21, %v544_v45 }
  0xc5   : > { %1405 = vmatmul.msk.bf16.gmra.mxu0 %vm471_vm0, %v1519_v44  ;;  %v615_v49 = vmax.f32 %v545_v46, 0.0 }
  0xca   : > { %v546_v47 = vpop.f32.mrf.mxu0 }
  0xcb   : > { %v547_v48 = vadd.f32 %v1689_v21, %v546_v47 }
  0xcd   : > { %v616_v50 = vmax.f32 %v547_v48, 0.0 }
  0xcf   : > { %v644_v51 = vpack.c.bf16 %v616_v50, %v615_v49 }
  0xd1   : > { %748 = vmatmul.bf16.gmra.mxu1 %v644_v51 }
  0xd2   : > { %v549_v53 = vpop.f32.mrf.mxu0 }
  0xd3   : > { %v550_v54 = vadd.f32 %v1689_v21, %v549_v53 }
  0xd5   : > { %1406 = vmatmul.msk.bf16.gmra.mxu0 %vm471_vm0, %v1520_v52  ;;  %v617_v57 = vmax.f32 %v550_v54, 0.0 }
  0xda   : > { %v551_v55 = vpop.f32.mrf.mxu0 }
  0xdb   : > { %v552_v56 = vadd.f32 %v1689_v21, %v551_v55 }
  0xdd   : > { %v618_v58 = vmax.f32 %v552_v56, 0.0 }
  0xdf   : > { %v645_v59 = vpack.c.bf16 %v618_v58, %v617_v57 }
  0xe1   : > { %753 = vmatmul.bf16.gmra.mxu1 %v645_v59 }
  0xe2   : > { %v554_v61 = vpop.f32.mrf.mxu0 }
  0xe3   : > { %v555_v62 = vadd.f32 %v1689_v21, %v554_v61 }
  0xe5   : > { %1407 = vmatmul.msk.bf16.gmra.mxu0 %vm471_vm0, %v1521_v60  ;;  %v619_v2 = vmax.f32 %v555_v62, 0.0 }
  0xea   : > { %v556_v63 = vpop.f32.mrf.mxu0 }
  0xeb   : > { %v557_v0 = vadd.f32 %v1689_v21, %v556_v63 }
  0xed   : > { %v620_v3 = vmax.f32 %v557_v0, 0.0 }
  0xef   : > { %v646_v4 = vpack.c.bf16 %v620_v3, %v619_v2 }
  0xf1   : > { %758 = vmatmul.bf16.gmra.mxu1 %v646_v4 }
  0xf2   : > { %v559_v7 = vpop.f32.mrf.mxu0 }
  0xf3   : > { %v560_v10 = vadd.f32 %v1689_v21, %v559_v7 }
  0xf5   : > { %1408 = vmatmul.msk.bf16.gmra.mxu0 %vm471_vm0, %v1522_v6  ;;  %v621_v14 = vmax.f32 %v560_v10, 0.0 }
  0xfa   : > { %v561_v11 = vpop.f32.mrf.mxu0 }
  0xfb   : > { %v562_v12 = vadd.f32 %v1689_v21, %v561_v11 }
  0xfd   : > { %v622_v15 = vmax.f32 %v562_v12, 0.0 }
  0xff   : > { %v647_v16 = vpack.c.bf16 %v622_v15, %v621_v14 }
 0x101   : > { %763 = vmatmul.bf16.gmra.mxu1 %v647_v16 }
 0x102   : > { %v564_v19 = vpop.f32.mrf.mxu0 }
 0x103   : > { %v565_v23 = vadd.f32 %v1689_v21, %v564_v19 }
 0x105   : > { %1409 = vmatmul.msk.bf16.gmra.mxu0 %vm471_vm0, %v1523_v18  ;;  %v623_v26 = vmax.f32 %v565_v23, 0.0 }
 0x10a   : > { %v566_v24 = vpop.f32.mrf.mxu0 }
 0x10b   : > { %v567_v25 = vadd.f32 %v1689_v21, %v566_v24 }
 0x10d   : > { %v624_v27 = vmax.f32 %v567_v25, 0.0 }
 0x10f   : > { %v648_v28 = vpack.c.bf16 %v624_v27, %v623_v26 }
 0x111   : > { %768 = vmatmul.bf16.gmra.mxu1 %v648_v28 }
 0x112   : > { %v569_v29 = vpop.f32.mrf.mxu0 }
 0x113   : > { %v570_v30 = vadd.f32 %v1689_v21, %v569_v29 }
 0x115   : > { %v625_v33 = vmax.f32 %v570_v30, 0.0 }
 0x11a   : > { %v571_v31 = vpop.f32.mrf.mxu0 }
 0x11b   : > { %v572_v32 = vadd.f32 %v1689_v21, %v571_v31 }
 0x11d   : > { %v626_v34 = vmax.f32 %v572_v32, 0.0 }
 0x11e   : > { %v734_v35 = vpop.f32.mrf.mxu1 }
 0x11f   : > { %v649_v36 = vpack.c.bf16 %v626_v34, %v625_v33  ;;  %v735_v39 = vadd.f32 %v1751_v37, %v734_v35 }
 0x121   : > { %773 = vmatmul.bf16.gmra.mxu1 %v649_v36  ;;  %v814_v42 = vmax.f32 %v735_v39, 0.0 }
 0x122   : > { %v574_v38 = vpop.f32.mrf.mxu0 }
 0x123   : > { %v575_v43 = vadd.f32 %v1689_v21, %v574_v38 }
 0x125   : > { %v627_v48 = vmax.f32 %v575_v43, 0.0 }
 0x126   : > { %v736_v40 = vpop.f32.mrf.mxu1 }
 0x127   : > { %v737_v41 = vadd.f32 %v1751_v37, %v736_v40 }
 0x129   : > { %v815_v44 = vmax.f32 %v737_v41, 0.0 }
 0x12a   : > { %v576_v45 = vpop.f32.mrf.mxu0 }
 0x12b   : > { %v577_v46 = vadd.f32 %v1689_v21, %v576_v45  ;;  %v846_v47 = vpack.c.bf16 %v815_v44, %v814_v42 }
 0x12d   : > { %v628_v49 = vmax.f32 %v577_v46, 0.0  ;;  %938 = vmatmul.bf16.vlgmr.msra.gmra.mxu2 %v846_v47 }
 0x12e   : > { %v739_v50 = vpop.f32.mrf.mxu1 }
 0x12f   : > { %v650_v51 = vpack.c.bf16 %v628_v49, %v627_v48  ;;  %v740_v53 = vadd.f32 %v1751_v37, %v739_v50 }
 0x131   : > { %778 = vmatmul.bf16.gmra.mxu1 %v650_v51  ;;  %v816_v56 = vmax.f32 %v740_v53, 0.0 }
 0x132   : > { %v579_v52 = vpop.f32.mrf.mxu0 }
 0x133   : > { %v580_v57 = vadd.f32 %v1689_v21, %v579_v52 }
 0x135   : > { %v629_v62 = vmax.f32 %v580_v57, 0.0 }
 0x136   : > { %v741_v54 = vpop.f32.mrf.mxu1 }
 0x137   : > { %v742_v55 = vadd.f32 %v1751_v37, %v741_v54 }
 0x139   : > { %v817_v58 = vmax.f32 %v742_v55, 0.0 }
 0x13a   : > { %v581_v59 = vpop.f32.mrf.mxu0 }
 0x13b   : > { %v582_v60 = vadd.f32 %v1689_v21, %v581_v59  ;;  %v847_v61 = vpack.c.bf16 %v817_v58, %v816_v56  ;;  %v1549_v59 = vld [vmem:[%s1974_s7 + $0x38] sm:$0xff] }
 0x13c   : > { %1135 = vmatpush.bf16.msra.mxu3 %v1549_v59 }
 0x13d   : > { %v630_v63 = vmax.f32 %v582_v60, 0.0  ;;  %943 = vmatmul.bf16.gmra.mxu2 %v847_v61  ;;  %v1548_v61 = vld [vmem:[%s1974_s7 + $0x30] sm:$0xff] }
 0x13e   : > { %v744_v0 = vpop.f32.mrf.mxu1 }
 0x13f   : > { %v651_v1 = vpack.c.bf16 %v630_v63, %v629_v62  ;;  %v745_v3 = vadd.f32 %v1751_v37, %v744_v0 }
 0x140   : > { %1136 = vmatpush.bf16.msra.mxu3 %v1548_v61 }
 0x141   : > { %783 = vmatmul.bf16.gmra.mxu1 %v651_v1  ;;  %v818_v6 = vmax.f32 %v745_v3, 0.0  ;;  %v1547_v1 = vld [vmem:[%s1974_s7 + $0x28] sm:$0xff] }
 0x142   : > { %v584_v2 = vpop.f32.mrf.mxu0 }
 0x143   : > { %v585_v7 = vadd.f32 %v1689_v21, %v584_v2 }
 0x144   : > { %1137 = vmatpush.bf16.msra.mxu3 %v1547_v1 }
 0x145   : > { %v631_v12 = vmax.f32 %v585_v7, 0.0 }
 0x146   : > { %v746_v4 = vpop.f32.mrf.mxu1 }
 0x147   : > { %v747_v5 = vadd.f32 %v1751_v37, %v746_v4 }
 0x149   : > { %v819_v8 = vmax.f32 %v747_v5, 0.0 }
 0x14a   : > { %v586_v9 = vpop.f32.mrf.mxu0 }
 0x14b   : > { %v587_v10 = vadd.f32 %v1689_v21, %v586_v9  ;;  %v848_v11 = vpack.c.bf16 %v819_v8, %v818_v6  ;;  %v1546_v6 = vld [vmem:[%s1974_s7 + $0x20] sm:$0xff] }
 0x14c   : > { %1138 = vmatpush.bf16.msra.mxu3 %v1546_v6 }
 0x14d   : > { %v632_v13 = vmax.f32 %v587_v10, 0.0  ;;  %948 = vmatmul.bf16.gmra.mxu2 %v848_v11 }
 0x14e   : > { %v749_v14 = vpop.f32.mrf.mxu1 }
 0x14f   : > { %v652_v15 = vpack.c.bf16 %v632_v13, %v631_v12  ;;  %v750_v17 = vadd.f32 %v1751_v37, %v749_v14  ;;  %v1545_v13 = vld [vmem:[%s1974_s7 + $0x18] sm:$0xff] }
 0x150   : > { %1139 = vmatpush.bf16.msra.mxu3 %v1545_v13 }
 0x151   : > { %788 = vmatmul.bf16.gmra.mxu1 %v652_v15  ;;  %v820_v20 = vmax.f32 %v750_v17, 0.0  ;;  %v1544_v15 = vld [vmem:[%s1974_s7 + $0x10] sm:$0xff]  ;;  %v1543_v17 = vld [vmem:[%s1974_s7 + $0x8] sm:$0xff] }
 0x152   : > { %v589_v16 = vpop.f32.mrf.mxu0 }
 0x153   : > { %v590_v22 = vadd.f32 %v1689_v21, %v589_v16 }
 0x154   : > { %1140 = vmatpush.bf16.msra.mxu3 %v1544_v15 }
 0x155   : > { %v633_v27 = vmax.f32 %v590_v22, 0.0  ;;  %v1542_v22 = vld [vmem:[%s1974_s7] sm:$0xff] }
 0x156   : > { %v751_v18 = vpop.f32.mrf.mxu1 }
 0x157   : > { %v752_v19 = vadd.f32 %v1751_v37, %v751_v18 }
 0x158   : > { %1141 = vmatpush.bf16.msra.mxu3 %v1543_v17 }
 0x159   : > { %v821_v23 = vmax.f32 %v752_v19, 0.0 }
 0x15a   : > { %v591_v24 = vpop.f32.mrf.mxu0 }
 0x15b   : > { %v592_v25 = vadd.f32 %v1689_v21, %v591_v24  ;;  %v849_v26 = vpack.c.bf16 %v821_v23, %v820_v20 }
 0x15c   : > { %1142 = vmatpush.bf16.msra.mxu3 %v1542_v22 }
 0x15d   : > { %v634_v28 = vmax.f32 %v592_v25, 0.0  ;;  %953 = vmatmul.bf16.gmra.mxu2 %v849_v26 }
 0x15e   : > { %v754_v29 = vpop.f32.mrf.mxu1 }
 0x15f   : > { %v653_v30 = vpack.c.bf16 %v634_v28, %v633_v27  ;;  %v755_v32 = vadd.f32 %v1751_v37, %v754_v29 }
 0x161   : > { %793 = vmatmul.bf16.gmra.mxu1 %v653_v30  ;;  %v822_v35 = vmax.f32 %v755_v32, 0.0 }
 0x162   : > { %v594_v31 = vpop.f32.mrf.mxu0 }
 0x163   : > { %v595_v36 = vadd.f32 %v1689_v21, %v594_v31 }
 0x165   : > { %v635_v42 = vmax.f32 %v595_v36, 0.0 }
 0x166   : > { %v756_v33 = vpop.f32.mrf.mxu1 }
 0x167   : > { %v757_v34 = vadd.f32 %v1751_v37, %v756_v33  ;;  %v1812_v33 = vld [vmem:[%s1973_s6] ss:$0 sm:$0xff] }
 0x169   : > { %v823_v38 = vmax.f32 %v757_v34, 0.0 }
 0x16a   : > { %v596_v39 = vpop.f32.mrf.mxu0 }
 0x16b   : > { %v597_v40 = vadd.f32 %v1689_v21, %v596_v39  ;;  %v850_v41 = vpack.c.bf16 %v823_v38, %v822_v35 }
 0x16d   : > { %v636_v43 = vmax.f32 %v597_v40, 0.0  ;;  %958 = vmatmul.bf16.gmra.mxu2 %v850_v41 }
 0x16e   : > { %v759_v44 = vpop.f32.mrf.mxu1 }
 0x16f   : > { %v654_v45 = vpack.c.bf16 %v636_v43, %v635_v42  ;;  %v760_v47 = vadd.f32 %v1751_v37, %v759_v44 }
 0x171   : > { %798 = vmatmul.bf16.gmra.mxu1 %v654_v45  ;;  %v824_v50 = vmax.f32 %v760_v47, 0.0 }
 0x172   : > { %v599_v46 = vpop.f32.mrf.mxu0 }
 0x173   : > { %v600_v51 = vadd.f32 %v1689_v21, %v599_v46 }
 0x175   : > { %v637_v56 = vmax.f32 %v600_v51, 0.0 }
 0x176   : > { %v761_v48 = vpop.f32.mrf.mxu1 }
 0x177   : > { %v762_v49 = vadd.f32 %v1751_v37, %v761_v48 }
 0x179   : > { %v825_v52 = vmax.f32 %v762_v49, 0.0 }
 0x17a   : > { %v601_v53 = vpop.f32.mrf.mxu0 }
 0x17b   : > { %v602_v54 = vadd.f32 %v1689_v21, %v601_v53  ;;  %v851_v55 = vpack.c.bf16 %v825_v52, %v824_v50 }
 0x17d   : > { %v638_v57 = vmax.f32 %v602_v54, 0.0  ;;  %963 = vmatmul.bf16.gmra.mxu2 %v851_v55 }
 0x17e   : > { %v764_v58 = vpop.f32.mrf.mxu1 }
 0x17f   : > { %v655_v60 = vpack.c.bf16 %v638_v57, %v637_v56  ;;  %v765_v63 = vadd.f32 %v1751_v37, %v764_v58 }
 0x181   : > { %803 = vmatmul.bf16.gmra.mxu1 %v655_v60  ;;  %v826_v3 = vmax.f32 %v765_v63, 0.0 }
 0x182   : > { %v604_v62 = vpop.f32.mrf.mxu0 }
 0x183   : > { %v605_v4 = vadd.f32 %v1689_v21, %v604_v62 }
 0x185   : > { %v639_v10 = vmax.f32 %v605_v4, 0.0 }
 0x186   : > { %v766_v0 = vpop.f32.mrf.mxu1 }
 0x187   : > { %v767_v2 = vadd.f32 %v1751_v37, %v766_v0 }
 0x189   : > { %v827_v5 = vmax.f32 %v767_v2, 0.0 }
 0x18a   : > { %v606_v7 = vpop.f32.mrf.mxu0 }
 0x18b   : > { %v607_v8 = vadd.f32 %v1689_v21, %v606_v7  ;;  %v852_v9 = vpack.c.bf16 %v827_v5, %v826_v3 }
 0x18d   : > { %v640_v11 = vmax.f32 %v607_v8, 0.0  ;;  %968 = vmatmul.bf16.gmra.mxu2 %v852_v9 }
 0x18e   : > { %v769_v12 = vpop.f32.mrf.mxu1 }
 0x18f   : > { %v656_v14 = vpack.c.bf16 %v640_v11, %v639_v10  ;;  %v770_v21 = vadd.f32 %v1751_v37, %v769_v12 }
 0x191   : > { %808 = vmatmul.bf16.gmra.mxu1 %v656_v14  ;;  %v828_v19 = vmax.f32 %v770_v21, 0.0 }
 0x196   : > { %v771_v16 = vpop.f32.mrf.mxu1 }
 0x197   : > { %v772_v18 = vadd.f32 %v1751_v37, %v771_v16 }
 0x199   : > { %v829_v20 = vmax.f32 %v772_v18, 0.0 }
 0x19b   : > { %v853_v23 = vpack.c.bf16 %v829_v20, %v828_v19 }
 0x19d   : > { %973 = vmatmul.bf16.gmra.mxu2 %v853_v23 }
 0x19e   : > { %v774_v24 = vpop.f32.mrf.mxu1 }
 0x19f   : > { %v775_v25 = vadd.f32 %v1751_v37, %v774_v24 }
 0x1a1   : > { %v830_v28 = vmax.f32 %v775_v25, 0.0 }
 0x1a6   : > { %v776_v26 = vpop.f32.mrf.mxu1 }
 0x1a7   : > { %v777_v27 = vadd.f32 %v1751_v37, %v776_v26 }
 0x1a9   : > { %v831_v29 = vmax.f32 %v777_v27, 0.0 }
 0x1ab   : > { %v854_v30 = vpack.c.bf16 %v831_v29, %v830_v28 }
 0x1ad   : > { %978 = vmatmul.bf16.gmra.mxu2 %v854_v30 }
 0x1ae   : > { %v779_v31 = vpop.f32.mrf.mxu1 }
 0x1af   : > { %v780_v34 = vadd.f32 %v1751_v37, %v779_v31 }
 0x1b0   : > { %v939_v32 = vpop.f32.mrf.mxu2 }
 0x1b1   : > { %v940_v36 = vadd.f32 %v1812_v33, %v939_v32  ;;  %v832_v40 = vmax.f32 %v780_v34, 0.0 }
 0x1b3   : > { %v1019_v43 = vmax.f32 %v940_v36, 0.0 }
 0x1b6   : > { %v781_v35 = vpop.f32.mrf.mxu1 }
 0x1b7   : > { %v782_v38 = vadd.f32 %v1751_v37, %v781_v35 }
 0x1b8   : > { %v941_v39 = vpop.f32.mrf.mxu2 }
 0x1b9   : > { %v833_v41 = vmax.f32 %v782_v38, 0.0  ;;  %v942_v42 = vadd.f32 %v1812_v33, %v941_v39 }
 0x1bb   : > { %v1020_v44 = vmax.f32 %v942_v42, 0.0  ;;  %v855_v45 = vpack.c.bf16 %v833_v41, %v832_v40 }
 0x1bd   : > { %983 = vmatmul.bf16.gmra.mxu2 %v855_v45  ;;  %v1051_v46 = vpack.c.bf16 %v1020_v44, %v1019_v43 }
 0x1be   : > { %v784_v47 = vpop.f32.mrf.mxu1 }
 0x1bf   : > { %1143 = vmatmul.bf16.vlgmr.msra.gmra.mxu3 %v1051_v46  ;;  %v785_v49 = vadd.f32 %v1751_v37, %v784_v47 }
 0x1c0   : > { %v944_v48 = vpop.f32.mrf.mxu2 }
 0x1c1   : > { %v945_v51 = vadd.f32 %v1812_v33, %v944_v48  ;;  %v834_v54 = vmax.f32 %v785_v49, 0.0 }
 0x1c3   : > { %v1021_v57 = vmax.f32 %v945_v51, 0.0 }
 0x1c6   : > { %v786_v50 = vpop.f32.mrf.mxu1 }
 0x1c7   : > { %v787_v52 = vadd.f32 %v1751_v37, %v786_v50 }
 0x1c8   : > { %v946_v53 = vpop.f32.mrf.mxu2 }
 0x1c9   : > { %v835_v55 = vmax.f32 %v787_v52, 0.0  ;;  %v947_v56 = vadd.f32 %v1812_v33, %v946_v53 }
 0x1cb   : > { %v1022_v58 = vmax.f32 %v947_v56, 0.0  ;;  %v856_v59 = vpack.c.bf16 %v835_v55, %v834_v54 }
 0x1cd   : > { %988 = vmatmul.bf16.gmra.mxu2 %v856_v59  ;;  %v1052_v60 = vpack.c.bf16 %v1022_v58, %v1021_v57 }
 0x1ce   : > { %v789_v61 = vpop.f32.mrf.mxu1 }
 0x1cf   : > { %1148 = vmatmul.bf16.gmra.mxu3 %v1052_v60  ;;  %v790_v63 = vadd.f32 %v1751_v37, %v789_v61 }
 0x1d0   : > { %v949_v62 = vpop.f32.mrf.mxu2 }
 0x1d1   : > { %v950_v1 = vadd.f32 %v1812_v33, %v949_v62  ;;  %v836_v4 = vmax.f32 %v790_v63, 0.0 }
 0x1d3   : > { %v1023_v7 = vmax.f32 %v950_v1, 0.0 }
 0x1d6   : > { %v791_v0 = vpop.f32.mrf.mxu1 }
 0x1d7   : > { %v792_v2 = vadd.f32 %v1751_v37, %v791_v0 }
 0x1d8   : > { %v951_v3 = vpop.f32.mrf.mxu2 }
 0x1d9   : > { %v837_v5 = vmax.f32 %v792_v2, 0.0  ;;  %v952_v6 = vadd.f32 %v1812_v33, %v951_v3 }
 0x1db   : > { %v1024_v8 = vmax.f32 %v952_v6, 0.0  ;;  %v857_v9 = vpack.c.bf16 %v837_v5, %v836_v4 }
 0x1dd   : > { %993 = vmatmul.bf16.gmra.mxu2 %v857_v9  ;;  %v1053_v10 = vpack.c.bf16 %v1024_v8, %v1023_v7 }
 0x1de   : > { %v794_v11 = vpop.f32.mrf.mxu1 }
 0x1df   : > { %1153 = vmatmul.bf16.gmra.mxu3 %v1053_v10  ;;  %v795_v13 = vadd.f32 %v1751_v37, %v794_v11 }
 0x1e0   : > { %v954_v12 = vpop.f32.mrf.mxu2 }
 0x1e1   : > { %v955_v15 = vadd.f32 %v1812_v33, %v954_v12  ;;  %v838_v17 = vmax.f32 %v795_v13, 0.0 }
 0x1e3   : > { %v1025_v20 = vmax.f32 %v955_v15, 0.0 }
 0x1e6   : > { %v796_v14 = vpop.f32.mrf.mxu1 }
 0x1e7   : > { %v797_v21 = vadd.f32 %v1751_v37, %v796_v14 }
 0x1e8   : > { %v956_v16 = vpop.f32.mrf.mxu2 }
 0x1e9   : > { %v839_v18 = vmax.f32 %v797_v21, 0.0  ;;  %v957_v19 = vadd.f32 %v1812_v33, %v956_v16 }
 0x1eb   : > { %v858_v22 = vpack.c.bf16 %v839_v18, %v838_v17  ;;  %v1026_v23 = vmax.f32 %v957_v19, 0.0  ;;  %v1847_v17 = vld [vmem:[#allocation2] ss:$0 sm:$0xff] }
 0x1ed   : > { %998 = vmatmul.bf16.gmra.mxu2 %v858_v22  ;;  %v1054_v24 = vpack.c.bf16 %v1026_v23, %v1025_v20 }
 0x1ee   : > { %v799_v25 = vpop.f32.mrf.mxu1 }
 0x1ef   : > { %1158 = vmatmul.bf16.gmra.mxu3 %v1054_v24  ;;  %v800_v27 = vadd.f32 %v1751_v37, %v799_v25 }
 0x1f0   : > { %v959_v26 = vpop.f32.mrf.mxu2 }
 0x1f1   : > { %v960_v29 = vadd.f32 %v1812_v33, %v959_v26  ;;  %v840_v32 = vmax.f32 %v800_v27, 0.0 }
 0x1f3   : > { %v1027_v36 = vmax.f32 %v960_v29, 0.0 }
 0x1f6   : > { %v801_v28 = vpop.f32.mrf.mxu1 }
 0x1f7   : > { %v802_v30 = vadd.f32 %v1751_v37, %v801_v28 }
 0x1f8   : > { %v961_v31 = vpop.f32.mrf.mxu2 }
 0x1f9   : > { %v841_v34 = vmax.f32 %v802_v30, 0.0  ;;  %v962_v35 = vadd.f32 %v1812_v33, %v961_v31 }
 0x1fb   : > { %v859_v38 = vpack.c.bf16 %v841_v34, %v840_v32  ;;  %v1028_v39 = vmax.f32 %v962_v35, 0.0 }
 0x1fd   : > { %1003 = vmatmul.bf16.gmra.mxu2 %v859_v38  ;;  %v1055_v40 = vpack.c.bf16 %v1028_v39, %v1027_v36 }
 0x1fe   : > { %v804_v41 = vpop.f32.mrf.mxu1 }
 0x1ff   : > { %1163 = vmatmul.bf16.gmra.mxu3 %v1055_v40  ;;  %v805_v43 = vadd.f32 %v1751_v37, %v804_v41 }
 0x200   : > { %v964_v42 = vpop.f32.mrf.mxu2 }
 0x201   : > { %v965_v45 = vadd.f32 %v1812_v33, %v964_v42  ;;  %v842_v48 = vmax.f32 %v805_v43, 0.0 }
 0x203   : > { %v1029_v51 = vmax.f32 %v965_v45, 0.0 }
 0x206   : > { %v806_v44 = vpop.f32.mrf.mxu1 }
 0x207   : > { %v807_v46 = vadd.f32 %v1751_v37, %v806_v44 }
 0x208   : > { %v966_v47 = vpop.f32.mrf.mxu2 }
 0x209   : > { %v843_v49 = vmax.f32 %v807_v46, 0.0  ;;  %v967_v50 = vadd.f32 %v1812_v33, %v966_v47 }
 0x20b   : > { %v860_v52 = vpack.c.bf16 %v843_v49, %v842_v48  ;;  %v1030_v53 = vmax.f32 %v967_v50, 0.0 }
 0x20d   : > { %1008 = vmatmul.bf16.gmra.mxu2 %v860_v52  ;;  %v1056_v54 = vpack.c.bf16 %v1030_v53, %v1029_v51 }
 0x20e   : > { %v809_v55 = vpop.f32.mrf.mxu1 }
 0x20f   : > { %1168 = vmatmul.bf16.gmra.mxu3 %v1056_v54  ;;  %v810_v57 = vadd.f32 %v1751_v37, %v809_v55 }
 0x210   : > { %v969_v56 = vpop.f32.mrf.mxu2 }
 0x211   : > { %v970_v59 = vadd.f32 %v1812_v33, %v969_v56  ;;  %v844_v62 = vmax.f32 %v810_v57, 0.0 }
 0x213   : > { %v1031_v1 = vmax.f32 %v970_v59, 0.0 }
 0x216   : > { %v811_v58 = vpop.f32.mrf.mxu1 }
 0x217   : > { %v812_v60 = vadd.f32 %v1751_v37, %v811_v58 }
 0x218   : > { %v971_v61 = vpop.f32.mrf.mxu2 }
 0x219   : > { %v845_v63 = vmax.f32 %v812_v60, 0.0  ;;  %v972_v0 = vadd.f32 %v1812_v33, %v971_v61 }
 0x21b   : > { %v861_v2 = vpack.c.bf16 %v845_v63, %v844_v62  ;;  %v1032_v3 = vmax.f32 %v972_v0, 0.0 }
 0x21d   : > { %1013 = vmatmul.bf16.gmra.mxu2 %v861_v2  ;;  %v1057_v4 = vpack.c.bf16 %v1032_v3, %v1031_v1 }
 0x21f   : > { %1173 = vmatmul.bf16.gmra.mxu3 %v1057_v4 }
 0x220   : > { %v974_v5 = vpop.f32.mrf.mxu2 }
 0x221   : > { %v975_v6 = vadd.f32 %v1812_v33, %v974_v5 }
 0x223   : > { %v1033_v9 = vmax.f32 %v975_v6, 0.0 }
 0x228   : > { %v976_v7 = vpop.f32.mrf.mxu2 }
 0x229   : > { %v977_v8 = vadd.f32 %v1812_v33, %v976_v7 }
 0x22b   : > { %v1034_v37 = vmax.f32 %v977_v8, 0.0 }
 0x22d   : > { %v1058_v10 = vpack.c.bf16 %v1034_v37, %v1033_v9 }
 0x22f   : > { %1178 = vmatmul.bf16.gmra.mxu3 %v1058_v10 }
 0x230   : > { %v979_v11 = vpop.f32.mrf.mxu2 }
 0x231   : > { %v980_v12 = vadd.f32 %v1812_v33, %v979_v11 }
 0x233   : > { %v1035_v15 = vmax.f32 %v980_v12, 0.0 }
 0x238   : > { %v981_v13 = vpop.f32.mrf.mxu2 }
 0x239   : > { %v982_v14 = vadd.f32 %v1812_v33, %v981_v13 }
 0x23b   : > { %v1036_v21 = vmax.f32 %v982_v14, 0.0 }
 0x23d   : > { %v1059_v16 = vpack.c.bf16 %v1036_v21, %v1035_v15 }
 0x23f   : > { %1183 = vmatmul.bf16.gmra.mxu3 %v1059_v16 }
 0x240   : > { %v984_v18 = vpop.f32.mrf.mxu2 }
 0x241   : > { %v985_v22 = vadd.f32 %v1812_v33, %v984_v18 }
 0x242   : > { %v1144_v19 = vpop.f32.mrf.mxu3 }
 0x243   : > { %v1145_v20 = vadd.f32 %v1847_v17, %v1144_v19  ;;  %v1037_v26 = vmax.f32 %v985_v22, 0.0 }
 0x245   : > { %1225 = vst.msk [vmem:[%s1852_s18] sm:$0xff] %vm1224_vm1, %v1145_v20 }
 0x248   : > { %v986_v23 = vpop.f32.mrf.mxu2 }
 0x249   : > { %v987_v24 = vadd.f32 %v1812_v33, %v986_v23 }
 0x24a   : > { %v1146_v25 = vpop.f32.mrf.mxu3 }
 0x24b   : > { %v1038_v27 = vmax.f32 %v987_v24, 0.0  ;;  %v1147_v28 = vadd.f32 %v1847_v17, %v1146_v25 }
 0x24d   : > { %1226 = vst.msk [vmem:[%s1852_s18 + $0x8] sm:$0xff] %vm1224_vm1, %v1147_v28  ;;  %v1060_v29 = vpack.c.bf16 %v1038_v27, %v1037_v26 }
 0x24f   : > { %1188 = vmatmul.bf16.gmra.mxu3 %v1060_v29 }
 0x250   : > { %v989_v30 = vpop.f32.mrf.mxu2 }
 0x251   : > { %v990_v34 = vadd.f32 %v1812_v33, %v989_v30 }
 0x252   : > { %v1149_v31 = vpop.f32.mrf.mxu3 }
 0x253   : > { %v1150_v32 = vadd.f32 %v1847_v17, %v1149_v31  ;;  %v1039_v39 = vmax.f32 %v990_v34, 0.0 }
 0x255   : > { %1227 = vst.msk [vmem:[%s1852_s18 + $0x10] sm:$0xff] %vm1224_vm1, %v1150_v32 }
 0x258   : > { %v991_v35 = vpop.f32.mrf.mxu2 }
 0x259   : > { %v992_v36 = vadd.f32 %v1812_v33, %v991_v35 }
 0x25a   : > { %v1151_v38 = vpop.f32.mrf.mxu3 }
 0x25b   : > { %v1040_v40 = vmax.f32 %v992_v36, 0.0  ;;  %v1152_v41 = vadd.f32 %v1847_v17, %v1151_v38 }
 0x25d   : > { %1228 = vst.msk [vmem:[%s1852_s18 + $0x18] sm:$0xff] %vm1224_vm1, %v1152_v41  ;;  %v1061_v42 = vpack.c.bf16 %v1040_v40, %v1039_v39 }
 0x25f   : > { %1193 = vmatmul.bf16.gmra.mxu3 %v1061_v42 }
 0x260   : > { %v994_v43 = vpop.f32.mrf.mxu2 }
 0x261   : > { %v995_v46 = vadd.f32 %v1812_v33, %v994_v43 }
 0x262   : > { %v1154_v44 = vpop.f32.mrf.mxu3 }
 0x263   : > { %v1155_v45 = vadd.f32 %v1847_v17, %v1154_v44  ;;  %v1041_v50 = vmax.f32 %v995_v46, 0.0 }
 0x265   : > { %1229 = vst.msk [vmem:[%s1852_s18 + $0x20] sm:$0xff] %vm1224_vm1, %v1155_v45 }
 0x268   : > { %v996_v47 = vpop.f32.mrf.mxu2 }
 0x269   : > { %v997_v48 = vadd.f32 %v1812_v33, %v996_v47 }
 0x26a   : > { %v1156_v49 = vpop.f32.mrf.mxu3 }
 0x26b   : > { %v1042_v51 = vmax.f32 %v997_v48, 0.0  ;;  %v1157_v52 = vadd.f32 %v1847_v17, %v1156_v49 }
 0x26d   : > { %1230 = vst.msk [vmem:[%s1852_s18 + $0x28] sm:$0xff] %vm1224_vm1, %v1157_v52  ;;  %v1062_v53 = vpack.c.bf16 %v1042_v51, %v1041_v50 }
 0x26f   : > { %1198 = vmatmul.bf16.gmra.mxu3 %v1062_v53 }
 0x270   : > { %v999_v54 = vpop.f32.mrf.mxu2 }
 0x271   : > { %v1000_v57 = vadd.f32 %v1812_v33, %v999_v54 }
 0x272   : > { %v1159_v55 = vpop.f32.mrf.mxu3 }
 0x273   : > { %v1160_v56 = vadd.f32 %v1847_v17, %v1159_v55  ;;  %v1043_v61 = vmax.f32 %v1000_v57, 0.0 }
 0x275   : > { %1231 = vst.msk [vmem:[%s1852_s18 + $0x30] sm:$0xff] %vm1224_vm1, %v1160_v56 }
 0x278   : > { %v1001_v58 = vpop.f32.mrf.mxu2 }
 0x279   : > { %v1002_v59 = vadd.f32 %v1812_v33, %v1001_v58 }
 0x27a   : > { %v1161_v60 = vpop.f32.mrf.mxu3 }
 0x27b   : > { %v1044_v62 = vmax.f32 %v1002_v59, 0.0  ;;  %v1162_v63 = vadd.f32 %v1847_v17, %v1161_v60 }
 0x27d   : > { %v1063_v0 = vpack.c.bf16 %v1044_v62, %v1043_v61  ;;  %1232 = vst.msk [vmem:[%s1852_s18 + $0x38] sm:$0xff] %vm1224_vm1, %v1162_v63 }
 0x27f   : > { %1203 = vmatmul.bf16.gmra.mxu3 %v1063_v0 }
 0x280   : > { %v1004_v1 = vpop.f32.mrf.mxu2 }
 0x281   : > { %v1005_v4 = vadd.f32 %v1812_v33, %v1004_v1 }
 0x282   : > { %v1164_v2 = vpop.f32.mrf.mxu3 }
 0x283   : > { %v1165_v3 = vadd.f32 %v1847_v17, %v1164_v2  ;;  %v1045_v8 = vmax.f32 %v1005_v4, 0.0 }
 0x285   : > { %1233 = vst.msk [vmem:[%s1852_s18 + $0x40] sm:$0xff] %vm1224_vm1, %v1165_v3 }
 0x288   : > { %v1006_v5 = vpop.f32.mrf.mxu2 }
 0x289   : > { %v1007_v6 = vadd.f32 %v1812_v33, %v1006_v5 }
 0x28a   : > { %v1166_v7 = vpop.f32.mrf.mxu3 }
 0x28b   : > { %v1046_v9 = vmax.f32 %v1007_v6, 0.0  ;;  %v1167_v37 = vadd.f32 %v1847_v17, %v1166_v7 }
 0x28d   : > { %v1064_v10 = vpack.c.bf16 %v1046_v9, %v1045_v8  ;;  %1234 = vst.msk [vmem:[%s1852_s18 + $0x48] sm:$0xff] %vm1224_vm1, %v1167_v37 }
 0x28f   : > { %1208 = vmatmul.bf16.gmra.mxu3 %v1064_v10 }
 0x290   : > { %v1009_v11 = vpop.f32.mrf.mxu2 }
 0x291   : > { %v1010_v14 = vadd.f32 %v1812_v33, %v1009_v11 }
 0x292   : > { %v1169_v12 = vpop.f32.mrf.mxu3 }
 0x293   : > { %v1170_v13 = vadd.f32 %v1847_v17, %v1169_v12  ;;  %v1047_v18 = vmax.f32 %v1010_v14, 0.0 }
 0x295   : > { %1235 = vst.msk [vmem:[%s1852_s18 + $0x50] sm:$0xff] %vm1224_vm1, %v1170_v13 }
 0x298   : > { %v1011_v15 = vpop.f32.mrf.mxu2 }
 0x299   : > { %v1012_v21 = vadd.f32 %v1812_v33, %v1011_v15 }
 0x29a   : > { %v1171_v16 = vpop.f32.mrf.mxu3 }
 0x29b   : > { %v1048_v19 = vmax.f32 %v1012_v21, 0.0  ;;  %v1172_v20 = vadd.f32 %v1847_v17, %v1171_v16 }
 0x29d   : > { %v1065_v22 = vpack.c.bf16 %v1048_v19, %v1047_v18  ;;  %1236 = vst.msk [vmem:[%s1852_s18 + $0x58] sm:$0xff] %vm1224_vm1, %v1172_v20 }
 0x29f   : > { %1213 = vmatmul.bf16.gmra.mxu3 %v1065_v22 }
 0x2a0   : > { %v1014_v23 = vpop.f32.mrf.mxu2 }
 0x2a1   : > { %v1015_v26 = vadd.f32 %v1812_v33, %v1014_v23 }
 0x2a2   : > { %v1174_v24 = vpop.f32.mrf.mxu3 }
 0x2a3   : > { %v1175_v25 = vadd.f32 %v1847_v17, %v1174_v24  ;;  %v1049_v30 = vmax.f32 %v1015_v26, 0.0 }
 0x2a5   : > { %1237 = vst.msk [vmem:[%s1852_s18 + $0x60] sm:$0xff] %vm1224_vm1, %v1175_v25 }
 0x2a8   : > { %v1016_v27 = vpop.f32.mrf.mxu2 }
 0x2a9   : > { %v1017_v28 = vadd.f32 %v1812_v33, %v1016_v27 }
 0x2aa   : > { %v1176_v29 = vpop.f32.mrf.mxu3 }
 0x2ab   : > { %v1050_v31 = vmax.f32 %v1017_v28, 0.0  ;;  %v1177_v32 = vadd.f32 %v1847_v17, %v1176_v29 }
 0x2ad   : > { %v1066_v34 = vpack.c.bf16 %v1050_v31, %v1049_v30  ;;  %1238 = vst.msk [vmem:[%s1852_s18 + $0x68] sm:$0xff] %vm1224_vm1, %v1177_v32 }
 0x2af   : > { %1218 = vmatmul.bf16.gmra.mxu3 %v1066_v34 }
 0x2b2   : > { %v1179_v35 = vpop.f32.mrf.mxu3 }
 0x2b3   : > { %v1180_v36 = vadd.f32 %v1847_v17, %v1179_v35 }
 0x2b5   : > { %1239 = vst.msk [vmem:[%s1852_s18 + $0x70] sm:$0xff] %vm1224_vm1, %v1180_v36 }
 0x2ba   : > { %v1181_v38 = vpop.f32.mrf.mxu3 }
 0x2bb   : > { %v1182_v33 = vadd.f32 %v1847_v17, %v1181_v38 }
 0x2bd   : > { %1240 = vst.msk [vmem:[%s1852_s18 + $0x78] sm:$0xff] %vm1224_vm1, %v1182_v33 }
 0x2c2   : > { %v1184_v39 = vpop.f32.mrf.mxu3 }
 0x2c3   : > { %v1185_v40 = vadd.f32 %v1847_v17, %v1184_v39 }
 0x2c5   : > { %1241 = vst.msk [vmem:[%s1852_s18 + $0x80] sm:$0xff] %vm1224_vm1, %v1185_v40 }
 0x2ca   : > { %v1186_v41 = vpop.f32.mrf.mxu3 }
 0x2cb   : > { %v1187_v42 = vadd.f32 %v1847_v17, %v1186_v41 }
 0x2cd   : > { %1242 = vst.msk [vmem:[%s1852_s18 + $0x88] sm:$0xff] %vm1224_vm1, %v1187_v42 }
 0x2d2   : > { %v1189_v43 = vpop.f32.mrf.mxu3 }
 0x2d3   : > { %v1190_v44 = vadd.f32 %v1847_v17, %v1189_v43 }
 0x2d5   : > { %1243 = vst.msk [vmem:[%s1852_s18 + $0x90] sm:$0xff] %vm1224_vm1, %v1190_v44 }
 0x2da   : > { %v1191_v45 = vpop.f32.mrf.mxu3 }
 0x2db   : > { %v1192_v46 = vadd.f32 %v1847_v17, %v1191_v45 }
 0x2dd   : > { %1244 = vst.msk [vmem:[%s1852_s18 + $0x98] sm:$0xff] %vm1224_vm1, %v1192_v46 }
 0x2e2   : > { %v1194_v47 = vpop.f32.mrf.mxu3 }
 0x2e3   : > { %v1195_v48 = vadd.f32 %v1847_v17, %v1194_v47 }
 0x2e5   : > { %1245 = vst.msk [vmem:[%s1852_s18 + $0xa0] sm:$0xff] %vm1224_vm1, %v1195_v48 }
 0x2ea   : > { %v1196_v49 = vpop.f32.mrf.mxu3 }
 0x2eb   : > { %v1197_v50 = vadd.f32 %v1847_v17, %v1196_v49 }
 0x2ed   : > { %1246 = vst.msk [vmem:[%s1852_s18 + $0xa8] sm:$0xff] %vm1224_vm1, %v1197_v50 }
 0x2f2   : > { %v1199_v51 = vpop.f32.mrf.mxu3 }
 0x2f3   : > { %v1200_v52 = vadd.f32 %v1847_v17, %v1199_v51 }
 0x2f5   : > { %1247 = vst.msk [vmem:[%s1852_s18 + $0xb0] sm:$0xff] %vm1224_vm1, %v1200_v52 }
 0x2fa   : > { %v1201_v53 = vpop.f32.mrf.mxu3 }
 0x2fb   : > { %v1202_v54 = vadd.f32 %v1847_v17, %v1201_v53 }
 0x2fd   : > { %1248 = vst.msk [vmem:[%s1852_s18 + $0xb8] sm:$0xff] %vm1224_vm1, %v1202_v54 }
 0x302   : > { %v1204_v55 = vpop.f32.mrf.mxu3 }
 0x303   : > { %v1205_v56 = vadd.f32 %v1847_v17, %v1204_v55 }
 0x305   : > { %1249 = vst.msk [vmem:[%s1852_s18 + $0xc0] sm:$0xff] %vm1224_vm1, %v1205_v56 }
 0x30a   : > { %v1206_v57 = vpop.f32.mrf.mxu3 }
 0x30b   : > { %v1207_v58 = vadd.f32 %v1847_v17, %v1206_v57 }
 0x30d   : > { %1250 = vst.msk [vmem:[%s1852_s18 + $0xc8] sm:$0xff] %vm1224_vm1, %v1207_v58 }
 0x312   : > { %v1209_v59 = vpop.f32.mrf.mxu3 }
 0x313   : > { %v1210_v60 = vadd.f32 %v1847_v17, %v1209_v59 }
 0x315   : > { %1251 = vst.msk [vmem:[%s1852_s18 + $0xd0] sm:$0xff] %vm1224_vm1, %v1210_v60 }
 0x31a   : > { %v1211_v61 = vpop.f32.mrf.mxu3 }
 0x31b   : > { %v1212_v62 = vadd.f32 %v1847_v17, %v1211_v61 }
 0x31d   : > { %1252 = vst.msk [vmem:[%s1852_s18 + $0xd8] sm:$0xff] %vm1224_vm1, %v1212_v62 }
 0x322   : > { %v1214_v63 = vpop.f32.mrf.mxu3 }
 0x323   : > { %v1215_v0 = vadd.f32 %v1847_v17, %v1214_v63 }
 0x325   : > { %1253 = vst.msk [vmem:[%s1852_s18 + $0xe0] sm:$0xff] %vm1224_vm1, %v1215_v0 }
 0x32a   : > { %v1216_v1 = vpop.f32.mrf.mxu3 }
 0x32b   : > { %v1217_v2 = vadd.f32 %v1847_v17, %v1216_v1 }
 0x32d   : > { %1254 = vst.msk [vmem:[%s1852_s18 + $0xe8] sm:$0xff] %vm1224_vm1, %v1217_v2 }
 0x332   : > { %v1219_v3 = vpop.f32.mrf.mxu3 }
 0x333   : > { %v1220_v4 = vadd.f32 %v1847_v17, %v1219_v3 }
 0x335   : > { %1255 = vst.msk [vmem:[%s1852_s18 + $0xf0] sm:$0xff] %vm1224_vm1, %v1220_v4 }
 0x33a   : > { %v1221_v5 = vpop.f32.mrf.mxu3 }
 0x33b   : > { %v1222_v6 = vadd.f32 %v1847_v17, %v1221_v5 }
 0x33d   : > { %1256 = vst.msk [vmem:[%s1852_s18 + $0xf8] sm:$0xff] %vm1224_vm1, %v1222_v6 }
 0x33e PF: > { %s21_s11 = sadd.s32 1, %s1568_s11  }
 0x33f   : > { %p18_p4 = scmp.ge.s32.totalorder %s21_s11, 6  }
 0x341   :  { %20 = sbr.rel (!%p18_p4) target bundleno = 3 (0x3), region = 86 }

</bundles_post_ra>
